<compile_context>
chip_gen: v5e
topology: v5e:2x2
jax: 0.10.0
libtpu: 0.0.40
codegen_flags: <defaults>
</compile_context>

<pallas_src>
import math
import functools

import jax
import jax.numpy as jnp
from jax.experimental import pallas as pl
from jax.experimental.pallas import tpu as pltpu


_GELU_C = math.sqrt(2.0 / math.pi)

_WEIGHT_NAMES = ("wq", "bq", "wk", "bk", "wv", "bv", "wo", "bo",
                 "g1", "be1", "w1", "bf1", "w2", "bf2", "g2", "be2")


def encoder_layer_kernel(x_ref,
                         wq_ref, bq_ref, wk_ref, bk_ref, wv_ref, bv_ref,
                         wo_ref, bo_ref, g1_ref, be1_ref,
                         w1_ref, bf1_ref, w2_ref, bf2_ref, g2_ref, be2_ref,
                         out_ref,
                         x_scr, ctx_scr,
                         *, batch, seq, num_head):
    """One grid step == one Encoder_Layer applied to the VMEM-resident activation slab."""
    l = pl.program_id(0)
    E = wq_ref.shape[-1]
    dh = E // num_head
    scale = 1.0 / math.sqrt(dh)

    # ---- layer 0: load the input block into the activation-carry scratch ----------
    @pl.when(l == 0)
    def _():
        x_scr[...] = x_ref[...].astype(jnp.float32)

    x = x_scr[...]                                   # (BS, D) f32, resident across layers
    xb = x.astype(jnp.bfloat16)

    wq = wq_ref[0]; wk = wk_ref[0]; wv = wv_ref[0]   # (D, E) bf16 — this layer only
    wo = wo_ref[0]; w1 = w1_ref[0]; w2 = w2_ref[0]

    # ---- QKV projections on the flat slab: (BS, D) @ (D, E), bf16 in / f32 acc ----
    # f32 results die immediately after the bias-add + bf16 cast (small residency).
    q = (jnp.dot(xb, wq, preferred_element_type=jnp.float32) + bq_ref[0]).astype(jnp.bfloat16)
    k = (jnp.dot(xb, wk, preferred_element_type=jnp.float32) + bk_ref[0]).astype(jnp.bfloat16)
    v = (jnp.dot(xb, wv, preferred_element_type=jnp.float32) + bv_ref[0]).astype(jnp.bfloat16)

    # ---- multi-head attention, per batch element (S x S scores, implicit masking) ---
    # TODO(synk): for realistic dims restructure to a head-batched (H, S, dh) dot_general
    # (or pad dh to a 128 multiple) and replace the static unroll with a fori_loop; at the
    # toy config the per-head 2-D dots are already sub-MXU-tile.
    for b in range(batch):                           # static: batch is small & compile-time
        r0 = b * seq
        for h in range(num_head):
            c0 = h * dh
            qh = q[r0:r0 + seq, c0:c0 + dh]          # (S, dh) bf16
            kh = k[r0:r0 + seq, c0:c0 + dh]
            vh = v[r0:r0 + seq, c0:c0 + dh]
            s = jnp.dot(qh, kh.T, preferred_element_type=jnp.float32) * scale   # (S, S) f32
            s = s - jnp.max(s, axis=-1, keepdims=True)
            p = jnp.exp(s)
            p = p / jnp.sum(p, axis=-1, keepdims=True)          # exact softmax (f32)
            ctx_scr[r0:r0 + seq, c0:c0 + dh] = jnp.dot(
                p.astype(jnp.bfloat16), vh, preferred_element_type=jnp.float32)

    attn = ctx_scr[...]                                          # (BS, E) f32
    attn_out = jnp.dot(attn.astype(jnp.bfloat16), wo,
                       preferred_element_type=jnp.float32) + bo_ref[0]

    # ---- residual + LayerNorm 1 -----------------------------------------------------
    x1 = x + attn_out
    mu = jnp.mean(x1, axis=-1, keepdims=True)
    var = jnp.mean((x1 - mu) ** 2, axis=-1, keepdims=True)
    xn = (x1 - mu) * jax.lax.rsqrt(var + 1e-5) * g1_ref[0] + be1_ref[0]

    # ---- feed-forward with tanh-approx GELU (matches the reference GELU module) -----
    # TODO(synk): at realistic BS/F the (BS, F) f32 intermediate should be row-tiled.
    hid = jnp.dot(xn.astype(jnp.bfloat16), w1,
                  preferred_element_type=jnp.float32) + bf1_ref[0]
    hid = 0.5 * hid * (1.0 + jnp.tanh(_GELU_C * (hid + 0.044715 * hid ** 3)))
    y = jnp.dot(hid.astype(jnp.bfloat16), w2,
                preferred_element_type=jnp.float32) + bf2_ref[0]

    # ---- residual + LayerNorm 2 -----------------------------------------------------
    y1 = xn + y
    mu2 = jnp.mean(y1, axis=-1, keepdims=True)
    var2 = jnp.mean((y1 - mu2) ** 2, axis=-1, keepdims=True)
    xo = (y1 - mu2) * jax.lax.rsqrt(var2 + 1e-5) * g2_ref[0] + be2_ref[0]

    x_scr[...] = xo                                  # carry to next layer (stays in VMEM)

    # ---- last layer: write back the final activations --------------------------------
    @pl.when(l == pl.num_programs(0) - 1)
    def _():
        out_ref[...] = xo.astype(out_ref.dtype)


def _layer_weight_spec(w):
    """Per-layer slice of a stacked (L, ...) weight: block (1, ...) indexed by the layer axis."""
    nd = w.ndim
    return pl.BlockSpec((1,) + tuple(w.shape[1:]),
                        lambda l, _nd=nd: (l,) + (0,) * (_nd - 1))


def _vmem_limit_bytes(BS, D, E, F, S, num_head, weights):
    """Footprint-derived scoped-VMEM budget (headroom included, capped below v7x physical)."""
    per_layer_w = sum(math.prod(w.shape[1:]) * w.dtype.itemsize for w in weights)
    io_blocks = 2 * (BS * D * 4) * 2                 # x + out blocks, double-buffered
    scratch = BS * D * 4 + BS * E * 4                # activation carry + attention context
    transient = (3 * BS * E * 6                      # q/k/v f32 + bf16 copies
                 + 2 * num_head * S * S * 4          # one head's scores + probs (f32)
                 + BS * F * 6                        # FFN hidden f32 + bf16
                 + 6 * BS * D * 4)                   # residual / LayerNorm temporaries
    need = 2 * per_layer_w + io_blocks + scratch + transient
    return int(min(max(2 * need, 16 << 20), 48 << 20))


def transformer_encoder(x, params, *, num_head):
    """Transformer_Encoder forward.  x: (B, S, D) float32; params: stacked per-layer weights."""
    B, S, D = x.shape
    L, _, E = params["wq"].shape
    F = params["w1"].shape[-1]
    assert E % num_head == 0, "embed_dim must be divisible by num_head"
    BS = B * S
    dh = E // num_head

    weights = [params[n] for n in _WEIGHT_NAMES]
    xf = x.reshape(BS, D)                            # lane-friendly flat activation slab

    in_specs = [pl.BlockSpec((BS, D), lambda l: (0, 0))] \
             + [_layer_weight_spec(w) for w in weights]
    out_spec = pl.BlockSpec((BS, D), lambda l: (0, 0))

    # Advisory cost estimate (matmul flops; exp/tanh/rsqrt transcendentals).
    flops_layer = (3 * 2 * BS * D * E                # QKV projections
                   + 4 * B * S * S * E               # per-batch scores + context
                   + 2 * BS * E * D                  # output projection
                   + 2 * 2 * BS * D * F)             # feed-forward
    trans_layer = B * num_head * S * S + BS * F + 2 * BS
    bytes_accessed = 2 * BS * D * 4 + sum(int(w.size) * w.dtype.itemsize for w in weights)

    kernel = functools.partial(encoder_layer_kernel, batch=B, seq=S, num_head=num_head)

    out_flat = pl.pallas_call(
        kernel,
        out_shape=jax.ShapeDtypeStruct((BS, D), x.dtype),
        grid_spec=pltpu.PrefetchScalarGridSpec(
            num_scalar_prefetch=0,
            grid=(L,),                               # one grid step per layer
            in_specs=in_specs,
            out_specs=out_spec,
            scratch_shapes=[pltpu.VMEM((BS, D), jnp.float32),   # activation carry
                            pltpu.VMEM((BS, E), jnp.float32)],  # attention context
        ),
        compiler_params=pltpu.CompilerParams(
            dimension_semantics=("arbitrary",),      # layer axis carries state (sequential)
            vmem_limit_bytes=_vmem_limit_bytes(BS, D, E, F, S, num_head, weights),
        ),
        cost_estimate=pl.CostEstimate(flops=L * flops_layer,
                                      transcendentals=L * trans_layer,
                                      bytes_accessed=int(bytes_accessed)),
    )(xf, *weights)
    return out_flat.reshape(B, S, D)


def init_params(key, num_layer, input_dim, embed_dim, dim_feedforward):
    """Stacked per-layer parameters; matmul weights bf16, biases/LayerNorm params f32."""
    L, D, E, F = num_layer, input_dim, embed_dim, dim_feedforward
    ks = jax.random.split(key, 6)
    s = 0.02

    def w(k, shape):
        return (s * jax.random.normal(k, shape, jnp.float32)).astype(jnp.bfloat16)

    return {
        "wq": w(ks[0], (L, D, E)), "bq": jnp.zeros((L, 1, E), jnp.float32),
        "wk": w(ks[1], (L, D, E)), "bk": jnp.zeros((L, 1, E), jnp.float32),
        "wv": w(ks[2], (L, D, E)), "bv": jnp.zeros((L, 1, E), jnp.float32),
        "wo": w(ks[3], (L, E, D)), "bo": jnp.zeros((L, 1, D), jnp.float32),
        "g1": jnp.ones((L, 1, D), jnp.float32), "be1": jnp.zeros((L, 1, D), jnp.float32),
        "w1": w(ks[4], (L, D, F)), "bf1": jnp.zeros((L, 1, F), jnp.float32),
        "w2": w(ks[5], (L, F, D)), "bf2": jnp.zeros((L, 1, D), jnp.float32),
        "g2": jnp.ones((L, 1, D), jnp.float32), "be2": jnp.zeros((L, 1, D), jnp.float32),
    }


if __name__ == "__main__":
    # Small config: num_layer=2, input_dim=32, embed_dim=32, num_head=4, dim_feedforward=64
    num_layer, input_dim, embed_dim, num_head, dim_ff = 2, 32, 32, 4, 64
    B, S = 2, 8

    key = jax.random.PRNGKey(0)
    kx, kp = jax.random.split(key)
    x = jax.random.normal(kx, (B, S, input_dim), jnp.float32)
    params = init_params(kp, num_layer, input_dim, embed_dim, dim_ff)

    # TODO(synk): user-supplied attention mask and dropout>0 are not implemented
    # (reference forward uses mask=None, dropout=0.0); per-batch attention is where a
    # real additive mask would plug in.  A megacore-parallel batch axis (v7x) would
    # require a per-batch activation carry instead of the shared (BS, D) scratch.
    out = transformer_encoder(x, params, num_head=num_head)
    jax.block_until_ready(out)
    assert out.shape == (B, S, input_dim)
    print("KERNEL_OK")
</pallas_src>

<mosaic_0001>
module attributes {stable_mosaic.version = 11 : i64} {
  func.func @encoder_layer_kernel(%arg0: i32, %arg1: memref<16x32xf32, #tpu.memory_space<vmem>>, %arg2: memref<1x32x32xbf16, #tpu.memory_space<vmem>>, %arg3: memref<1x1x32xf32, #tpu.memory_space<vmem>>, %arg4: memref<1x32x32xbf16, #tpu.memory_space<vmem>>, %arg5: memref<1x1x32xf32, #tpu.memory_space<vmem>>, %arg6: memref<1x32x32xbf16, #tpu.memory_space<vmem>>, %arg7: memref<1x1x32xf32, #tpu.memory_space<vmem>>, %arg8: memref<1x32x32xbf16, #tpu.memory_space<vmem>>, %arg9: memref<1x1x32xf32, #tpu.memory_space<vmem>>, %arg10: memref<1x1x32xf32, #tpu.memory_space<vmem>>, %arg11: memref<1x1x32xf32, #tpu.memory_space<vmem>>, %arg12: memref<1x32x64xbf16, #tpu.memory_space<vmem>>, %arg13: memref<1x1x64xf32, #tpu.memory_space<vmem>>, %arg14: memref<1x64x32xbf16, #tpu.memory_space<vmem>>, %arg15: memref<1x1x32xf32, #tpu.memory_space<vmem>>, %arg16: memref<1x1x32xf32, #tpu.memory_space<vmem>>, %arg17: memref<1x1x32xf32, #tpu.memory_space<vmem>>, %arg18: memref<16x32xf32, #tpu.memory_space<vmem>>, %arg19: memref<16x32xf32, #tpu.memory_space<vmem>>, %arg20: memref<16x32xf32, #tpu.memory_space<vmem>>) attributes {dimension_semantics = [#tpu.dimension_semantics<arbitrary>], iteration_bounds = array<i64: 2>, scalar_prefetch = 0 : i64, scratch_operands = 2 : i64, tpu.core_type = #tpu.core_type<tc>, window_params = [{pipeline_mode = #tpu.pipeline_mode<synchronous>, transform_indices = @transform_0, window_bounds = array<i64: 16, 32>}, {transform_indices = @transform_1, window_bounds = array<i64: 1, 32, 32>}, {transform_indices = @transform_2, window_bounds = array<i64: 1, 1, 32>}, {transform_indices = @transform_3, window_bounds = array<i64: 1, 32, 32>}, {transform_indices = @transform_4, window_bounds = array<i64: 1, 1, 32>}, {transform_indices = @transform_5, window_bounds = array<i64: 1, 32, 32>}, {transform_indices = @transform_6, window_bounds = array<i64: 1, 1, 32>}, {transform_indices = @transform_7, window_bounds = array<i64: 1, 32, 32>}, {transform_indices = @transform_8, window_bounds = array<i64: 1, 1, 32>}, {transform_indices = @transform_9, window_bounds = array<i64: 1, 1, 32>}, {transform_indices = @transform_10, window_bounds = array<i64: 1, 1, 32>}, {transform_indices = @transform_11, window_bounds = array<i64: 1, 32, 64>}, {transform_indices = @transform_12, window_bounds = array<i64: 1, 1, 64>}, {transform_indices = @transform_13, window_bounds = array<i64: 1, 64, 32>}, {transform_indices = @transform_14, window_bounds = array<i64: 1, 1, 32>}, {transform_indices = @transform_15, window_bounds = array<i64: 1, 1, 32>}, {transform_indices = @transform_16, window_bounds = array<i64: 1, 1, 32>}, {pipeline_mode = #tpu.pipeline_mode<synchronous>, transform_indices = @transform_17, window_bounds = array<i64: 16, 32>}]} {
    %c0_i32 = arith.constant 0 : i32
    %0 = arith.cmpi eq, %arg0, %c0_i32 : i32
    %1 = arith.extui %0 : i1 to i32
    %c0_i32_0 = arith.constant 0 : i32
    %2 = arith.cmpi ne, %1, %c0_i32_0 : i32
    scf.if %2 {
      %c0_127 = arith.constant 0 : index
      %c0_128 = arith.constant 0 : index
      %277 = vector.load %arg1[%c0_127, %c0_128] : memref<16x32xf32, #tpu.memory_space<vmem>>, vector<16x32xf32>
      %c0_129 = arith.constant 0 : index
      %c0_130 = arith.constant 0 : index
      %278 = vector.load %arg19[%c0_129, %c0_130] : memref<16x32xf32, #tpu.memory_space<vmem>>, vector<16x32xf32>
      tpu.vector_store %arg19[%c0_129, %c0_130], %277 {strides = array<i32>} : memref<16x32xf32, #tpu.memory_space<vmem>>, vector<16x32xf32>,
    } else {
    }
    %c0 = arith.constant 0 : index
    %c0_1 = arith.constant 0 : index
    %3 = vector.load %arg19[%c0, %c0_1] : memref<16x32xf32, #tpu.memory_space<vmem>>, vector<16x32xf32>
    %4 = arith.truncf %3 : vector<16x32xf32> to vector<16x32xbf16>
    %c0_2 = arith.constant 0 : index
    %c0_3 = arith.constant 0 : index
    %c0_4 = arith.constant 0 : index
    %5 = vector.load %arg2[%c0_2, %c0_3, %c0_4] : memref<1x32x32xbf16, #tpu.memory_space<vmem>>, vector<1x32x32xbf16>
    %6 = vector.shape_cast %5 : vector<1x32x32xbf16> to vector<32x32xbf16>
    %c0_5 = arith.constant 0 : index
    %c0_6 = arith.constant 0 : index
    %c0_7 = arith.constant 0 : index
    %7 = vector.load %arg4[%c0_5, %c0_6, %c0_7] : memref<1x32x32xbf16, #tpu.memory_space<vmem>>, vector<1x32x32xbf16>
    %8 = vector.shape_cast %7 : vector<1x32x32xbf16> to vector<32x32xbf16>
    %c0_8 = arith.constant 0 : index
    %c0_9 = arith.constant 0 : index
    %c0_10 = arith.constant 0 : index
    %9 = vector.load %arg6[%c0_8, %c0_9, %c0_10] : memref<1x32x32xbf16, #tpu.memory_space<vmem>>, vector<1x32x32xbf16>
    %10 = vector.shape_cast %9 : vector<1x32x32xbf16> to vector<32x32xbf16>
    %c0_11 = arith.constant 0 : index
    %c0_12 = arith.constant 0 : index
    %c0_13 = arith.constant 0 : index
    %11 = vector.load %arg8[%c0_11, %c0_12, %c0_13] : memref<1x32x32xbf16, #tpu.memory_space<vmem>>, vector<1x32x32xbf16>
    %12 = vector.shape_cast %11 : vector<1x32x32xbf16> to vector<32x32xbf16>
    %c0_14 = arith.constant 0 : index
    %c0_15 = arith.constant 0 : index
    %c0_16 = arith.constant 0 : index
    %13 = vector.load %arg12[%c0_14, %c0_15, %c0_16] : memref<1x32x64xbf16, #tpu.memory_space<vmem>>, vector<1x32x64xbf16>
    %14 = vector.shape_cast %13 : vector<1x32x64xbf16> to vector<32x64xbf16>
    %c0_17 = arith.constant 0 : index
    %c0_18 = arith.constant 0 : index
    %c0_19 = arith.constant 0 : index
    %15 = vector.load %arg14[%c0_17, %c0_18, %c0_19] : memref<1x64x32xbf16, #tpu.memory_space<vmem>>, vector<1x64x32xbf16>
    %16 = vector.shape_cast %15 : vector<1x64x32xbf16> to vector<64x32xbf16>
    %cst = arith.constant dense<0.000000e+00> : vector<16x32xf32>
    %17 = tpu.matmul %4, %6, %cst {dimension_numbers = #tpu.dot_dimension_numbers<[1], [0], [0], [1], [0, 0, 1, 1], [], []>} : vector<16x32xbf16>, vector<32x32xbf16>, vector<16x32xf32> -> vector<16x32xf32>
    %c0_20 = arith.constant 0 : index
    %c0_21 = arith.constant 0 : index
    %c0_22 = arith.constant 0 : index
    %18 = vector.load %arg3[%c0_20, %c0_21, %c0_22] : memref<1x1x32xf32, #tpu.memory_space<vmem>>, vector<1x1x32xf32>
    %19 = vector.shape_cast %18 : vector<1x1x32xf32> to vector<1x32xf32>
    %20 = vector.broadcast %19 : vector<1x32xf32> to vector<16x32xf32>
    %21 = arith.addf %17, %20 : vector<16x32xf32>
    %22 = arith.truncf %21 : vector<16x32xf32> to vector<16x32xbf16>
    %cst_23 = arith.constant dense<0.000000e+00> : vector<16x32xf32>
    %23 = tpu.matmul %4, %8, %cst_23 {dimension_numbers = #tpu.dot_dimension_numbers<[1], [0], [0], [1], [0, 0, 1, 1], [], []>} : vector<16x32xbf16>, vector<32x32xbf16>, vector<16x32xf32> -> vector<16x32xf32>
    %c0_24 = arith.constant 0 : index
    %c0_25 = arith.constant 0 : index
    %c0_26 = arith.constant 0 : index
    %24 = vector.load %arg5[%c0_24, %c0_25, %c0_26] : memref<1x1x32xf32, #tpu.memory_space<vmem>>, vector<1x1x32xf32>
    %25 = vector.shape_cast %24 : vector<1x1x32xf32> to vector<1x32xf32>
    %26 = vector.broadcast %25 : vector<1x32xf32> to vector<16x32xf32>
    %27 = arith.addf %23, %26 : vector<16x32xf32>
    %28 = arith.truncf %27 : vector<16x32xf32> to vector<16x32xbf16>
    %cst_27 = arith.constant dense<0.000000e+00> : vector<16x32xf32>
    %29 = tpu.matmul %4, %10, %cst_27 {dimension_numbers = #tpu.dot_dimension_numbers<[1], [0], [0], [1], [0, 0, 1, 1], [], []>} : vector<16x32xbf16>, vector<32x32xbf16>, vector<16x32xf32> -> vector<16x32xf32>
    %c0_28 = arith.constant 0 : index
    %c0_29 = arith.constant 0 : index
    %c0_30 = arith.constant 0 : index
    %30 = vector.load %arg7[%c0_28, %c0_29, %c0_30] : memref<1x1x32xf32, #tpu.memory_space<vmem>>, vector<1x1x32xf32>
    %31 = vector.shape_cast %30 : vector<1x1x32xf32> to vector<1x32xf32>
    %32 = vector.broadcast %31 : vector<1x32xf32> to vector<16x32xf32>
    %33 = arith.addf %29, %32 : vector<16x32xf32>
    %34 = arith.truncf %33 : vector<16x32xf32> to vector<16x32xbf16>
    %35 = vector.extract_strided_slice %22 {offsets = [0, 0], sizes = [8, 8], strides = [1, 1]} : vector<16x32xbf16> to vector<8x8xbf16>
    %36 = vector.extract_strided_slice %28 {offsets = [0, 0], sizes = [8, 8], strides = [1, 1]} : vector<16x32xbf16> to vector<8x8xbf16>
    %37 = vector.extract_strided_slice %34 {offsets = [0, 0], sizes = [8, 8], strides = [1, 1]} : vector<16x32xbf16> to vector<8x8xbf16>
    %38 = tpu.transpose %36, [1, 0] : vector<8x8xbf16> -> vector<8x8xbf16>
    %cst_31 = arith.constant dense<0.000000e+00> : vector<8x8xf32>
    %39 = tpu.matmul %35, %38, %cst_31 {dimension_numbers = #tpu.dot_dimension_numbers<[1], [0], [0], [1], [0, 0, 1, 1], [], []>} : vector<8x8xbf16>, vector<8x8xbf16>, vector<8x8xf32> -> vector<8x8xf32>
    %cst_32 = arith.constant 0.353553385 : f32
    %40 = vector.broadcast %cst_32 : f32 to vector<8x8xf32>
    %41 = arith.mulf %39, %40 : vector<8x8xf32>
    %cst_33 = arith.constant dense<0xFF800000> : vector<8xf32>
    %42 = vector.multi_reduction <maximumf>, %41, %cst_33 [1] : vector<8x8xf32> to vector<8xf32>
    %43 = vector.shape_cast %42 : vector<8xf32> to vector<8x1xf32>
    %44 = vector.broadcast %43 : vector<8x1xf32> to vector<8x8xf32>
    %45 = arith.subf %41, %44 : vector<8x8xf32>
    %46 = math.exp %45 : vector<8x8xf32>
    %cst_34 = arith.constant dense<0.000000e+00> : vector<8xf32>
    %47 = vector.multi_reduction <add>, %46, %cst_34 [1] : vector<8x8xf32> to vector<8xf32>
    %48 = vector.shape_cast %47 : vector<8xf32> to vector<8x1xf32>
    %49 = vector.broadcast %48 : vector<8x1xf32> to vector<8x8xf32>
    %50 = arith.divf %46, %49 : vector<8x8xf32>
    %51 = arith.truncf %50 : vector<8x8xf32> to vector<8x8xbf16>
    %cst_35 = arith.constant dense<0.000000e+00> : vector<8x8xf32>
    %52 = tpu.matmul %51, %37, %cst_35 {dimension_numbers = #tpu.dot_dimension_numbers<[1], [0], [0], [1], [0, 0, 1, 1], [], []>} : vector<8x8xbf16>, vector<8x8xbf16>, vector<8x8xf32> -> vector<8x8xf32>
    %c0_36 = arith.constant 0 : index
    %c0_37 = arith.constant 0 : index
    %53 = vector.load %arg20[%c0_36, %c0_37] : memref<16x32xf32, #tpu.memory_space<vmem>>, vector<8x8xf32>
    tpu.vector_store %arg20[%c0_36, %c0_37], %52 {strides = array<i32>} : memref<16x32xf32, #tpu.memory_space<vmem>>, vector<8x8xf32>,
    %54 = vector.extract_strided_slice %22 {offsets = [0, 8], sizes = [8, 8], strides = [1, 1]} : vector<16x32xbf16> to vector<8x8xbf16>
    %55 = vector.extract_strided_slice %28 {offsets = [0, 8], sizes = [8, 8], strides = [1, 1]} : vector<16x32xbf16> to vector<8x8xbf16>
    %56 = vector.extract_strided_slice %34 {offsets = [0, 8], sizes = [8, 8], strides = [1, 1]} : vector<16x32xbf16> to vector<8x8xbf16>
    %57 = tpu.transpose %55, [1, 0] : vector<8x8xbf16> -> vector<8x8xbf16>
    %cst_38 = arith.constant dense<0.000000e+00> : vector<8x8xf32>
    %58 = tpu.matmul %54, %57, %cst_38 {dimension_numbers = #tpu.dot_dimension_numbers<[1], [0], [0], [1], [0, 0, 1, 1], [], []>} : vector<8x8xbf16>, vector<8x8xbf16>, vector<8x8xf32> -> vector<8x8xf32>
    %cst_39 = arith.constant 0.353553385 : f32
    %59 = vector.broadcast %cst_39 : f32 to vector<8x8xf32>
    %60 = arith.mulf %58, %59 : vector<8x8xf32>
    %cst_40 = arith.constant dense<0xFF800000> : vector<8xf32>
    %61 = vector.multi_reduction <maximumf>, %60, %cst_40 [1] : vector<8x8xf32> to vector<8xf32>
    %62 = vector.shape_cast %61 : vector<8xf32> to vector<8x1xf32>
    %63 = vector.broadcast %62 : vector<8x1xf32> to vector<8x8xf32>
    %64 = arith.subf %60, %63 : vector<8x8xf32>
    %65 = math.exp %64 : vector<8x8xf32>
    %cst_41 = arith.constant dense<0.000000e+00> : vector<8xf32>
    %66 = vector.multi_reduction <add>, %65, %cst_41 [1] : vector<8x8xf32> to vector<8xf32>
    %67 = vector.shape_cast %66 : vector<8xf32> to vector<8x1xf32>
    %68 = vector.broadcast %67 : vector<8x1xf32> to vector<8x8xf32>
    %69 = arith.divf %65, %68 : vector<8x8xf32>
    %70 = arith.truncf %69 : vector<8x8xf32> to vector<8x8xbf16>
    %cst_42 = arith.constant dense<0.000000e+00> : vector<8x8xf32>
    %71 = tpu.matmul %70, %56, %cst_42 {dimension_numbers = #tpu.dot_dimension_numbers<[1], [0], [0], [1], [0, 0, 1, 1], [], []>} : vector<8x8xbf16>, vector<8x8xbf16>, vector<8x8xf32> -> vector<8x8xf32>
    %c0_43 = arith.constant 0 : index
    %c8 = arith.constant 8 : index
    %72 = vector.load %arg20[%c0_43, %c8] : memref<16x32xf32, #tpu.memory_space<vmem>>, vector<8x8xf32>
    tpu.vector_store %arg20[%c0_43, %c8], %71 {strides = array<i32>} : memref<16x32xf32, #tpu.memory_space<vmem>>, vector<8x8xf32>,
    %73 = vector.extract_strided_slice %22 {offsets = [0, 16], sizes = [8, 8], strides = [1, 1]} : vector<16x32xbf16> to vector<8x8xbf16>
    %74 = vector.extract_strided_slice %28 {offsets = [0, 16], sizes = [8, 8], strides = [1, 1]} : vector<16x32xbf16> to vector<8x8xbf16>
    %75 = vector.extract_strided_slice %34 {offsets = [0, 16], sizes = [8, 8], strides = [1, 1]} : vector<16x32xbf16> to vector<8x8xbf16>
    %76 = tpu.transpose %74, [1, 0] : vector<8x8xbf16> -> vector<8x8xbf16>
    %cst_44 = arith.constant dense<0.000000e+00> : vector<8x8xf32>
    %77 = tpu.matmul %73, %76, %cst_44 {dimension_numbers = #tpu.dot_dimension_numbers<[1], [0], [0], [1], [0, 0, 1, 1], [], []>} : vector<8x8xbf16>, vector<8x8xbf16>, vector<8x8xf32> -> vector<8x8xf32>
    %cst_45 = arith.constant 0.353553385 : f32
    %78 = vector.broadcast %cst_45 : f32 to vector<8x8xf32>
    %79 = arith.mulf %77, %78 : vector<8x8xf32>
    %cst_46 = arith.constant dense<0xFF800000> : vector<8xf32>
    %80 = vector.multi_reduction <maximumf>, %79, %cst_46 [1] : vector<8x8xf32> to vector<8xf32>
    %81 = vector.shape_cast %80 : vector<8xf32> to vector<8x1xf32>
    %82 = vector.broadcast %81 : vector<8x1xf32> to vector<8x8xf32>
    %83 = arith.subf %79, %82 : vector<8x8xf32>
    %84 = math.exp %83 : vector<8x8xf32>
    %cst_47 = arith.constant dense<0.000000e+00> : vector<8xf32>
    %85 = vector.multi_reduction <add>, %84, %cst_47 [1] : vector<8x8xf32> to vector<8xf32>
    %86 = vector.shape_cast %85 : vector<8xf32> to vector<8x1xf32>
    %87 = vector.broadcast %86 : vector<8x1xf32> to vector<8x8xf32>
    %88 = arith.divf %84, %87 : vector<8x8xf32>
    %89 = arith.truncf %88 : vector<8x8xf32> to vector<8x8xbf16>
    %cst_48 = arith.constant dense<0.000000e+00> : vector<8x8xf32>
    %90 = tpu.matmul %89, %75, %cst_48 {dimension_numbers = #tpu.dot_dimension_numbers<[1], [0], [0], [1], [0, 0, 1, 1], [], []>} : vector<8x8xbf16>, vector<8x8xbf16>, vector<8x8xf32> -> vector<8x8xf32>
    %c0_49 = arith.constant 0 : index
    %c16 = arith.constant 16 : index
    %91 = vector.load %arg20[%c0_49, %c16] : memref<16x32xf32, #tpu.memory_space<vmem>>, vector<8x8xf32>
    tpu.vector_store %arg20[%c0_49, %c16], %90 {strides = array<i32>} : memref<16x32xf32, #tpu.memory_space<vmem>>, vector<8x8xf32>,
    %92 = vector.extract_strided_slice %22 {offsets = [0, 24], sizes = [8, 8], strides = [1, 1]} : vector<16x32xbf16> to vector<8x8xbf16>
    %93 = vector.extract_strided_slice %28 {offsets = [0, 24], sizes = [8, 8], strides = [1, 1]} : vector<16x32xbf16> to vector<8x8xbf16>
    %94 = vector.extract_strided_slice %34 {offsets = [0, 24], sizes = [8, 8], strides = [1, 1]} : vector<16x32xbf16> to vector<8x8xbf16>
    %95 = tpu.transpose %93, [1, 0] : vector<8x8xbf16> -> vector<8x8xbf16>
    %cst_50 = arith.constant dense<0.000000e+00> : vector<8x8xf32>
    %96 = tpu.matmul %92, %95, %cst_50 {dimension_numbers = #tpu.dot_dimension_numbers<[1], [0], [0], [1], [0, 0, 1, 1], [], []>} : vector<8x8xbf16>, vector<8x8xbf16>, vector<8x8xf32> -> vector<8x8xf32>
    %cst_51 = arith.constant 0.353553385 : f32
    %97 = vector.broadcast %cst_51 : f32 to vector<8x8xf32>
    %98 = arith.mulf %96, %97 : vector<8x8xf32>
    %cst_52 = arith.constant dense<0xFF800000> : vector<8xf32>
    %99 = vector.multi_reduction <maximumf>, %98, %cst_52 [1] : vector<8x8xf32> to vector<8xf32>
    %100 = vector.shape_cast %99 : vector<8xf32> to vector<8x1xf32>
    %101 = vector.broadcast %100 : vector<8x1xf32> to vector<8x8xf32>
    %102 = arith.subf %98, %101 : vector<8x8xf32>
    %103 = math.exp %102 : vector<8x8xf32>
    %cst_53 = arith.constant dense<0.000000e+00> : vector<8xf32>
    %104 = vector.multi_reduction <add>, %103, %cst_53 [1] : vector<8x8xf32> to vector<8xf32>
    %105 = vector.shape_cast %104 : vector<8xf32> to vector<8x1xf32>
    %106 = vector.broadcast %105 : vector<8x1xf32> to vector<8x8xf32>
    %107 = arith.divf %103, %106 : vector<8x8xf32>
    %108 = arith.truncf %107 : vector<8x8xf32> to vector<8x8xbf16>
    %cst_54 = arith.constant dense<0.000000e+00> : vector<8x8xf32>
    %109 = tpu.matmul %108, %94, %cst_54 {dimension_numbers = #tpu.dot_dimension_numbers<[1], [0], [0], [1], [0, 0, 1, 1], [], []>} : vector<8x8xbf16>, vector<8x8xbf16>, vector<8x8xf32> -> vector<8x8xf32>
    %c0_55 = arith.constant 0 : index
    %c24 = arith.constant 24 : index
    %110 = vector.load %arg20[%c0_55, %c24] : memref<16x32xf32, #tpu.memory_space<vmem>>, vector<8x8xf32>
    tpu.vector_store %arg20[%c0_55, %c24], %109 {strides = array<i32>} : memref<16x32xf32, #tpu.memory_space<vmem>>, vector<8x8xf32>,
    %111 = vector.extract_strided_slice %22 {offsets = [8, 0], sizes = [8, 8], strides = [1, 1]} : vector<16x32xbf16> to vector<8x8xbf16>
    %112 = vector.extract_strided_slice %28 {offsets = [8, 0], sizes = [8, 8], strides = [1, 1]} : vector<16x32xbf16> to vector<8x8xbf16>
    %113 = vector.extract_strided_slice %34 {offsets = [8, 0], sizes = [8, 8], strides = [1, 1]} : vector<16x32xbf16> to vector<8x8xbf16>
    %114 = tpu.transpose %112, [1, 0] : vector<8x8xbf16> -> vector<8x8xbf16>
    %cst_56 = arith.constant dense<0.000000e+00> : vector<8x8xf32>
    %115 = tpu.matmul %111, %114, %cst_56 {dimension_numbers = #tpu.dot_dimension_numbers<[1], [0], [0], [1], [0, 0, 1, 1], [], []>} : vector<8x8xbf16>, vector<8x8xbf16>, vector<8x8xf32> -> vector<8x8xf32>
    %cst_57 = arith.constant 0.353553385 : f32
    %116 = vector.broadcast %cst_57 : f32 to vector<8x8xf32>
    %117 = arith.mulf %115, %116 : vector<8x8xf32>
    %cst_58 = arith.constant dense<0xFF800000> : vector<8xf32>
    %118 = vector.multi_reduction <maximumf>, %117, %cst_58 [1] : vector<8x8xf32> to vector<8xf32>
    %119 = vector.shape_cast %118 : vector<8xf32> to vector<8x1xf32>
    %120 = vector.broadcast %119 : vector<8x1xf32> to vector<8x8xf32>
    %121 = arith.subf %117, %120 : vector<8x8xf32>
    %122 = math.exp %121 : vector<8x8xf32>
    %cst_59 = arith.constant dense<0.000000e+00> : vector<8xf32>
    %123 = vector.multi_reduction <add>, %122, %cst_59 [1] : vector<8x8xf32> to vector<8xf32>
    %124 = vector.shape_cast %123 : vector<8xf32> to vector<8x1xf32>
    %125 = vector.broadcast %124 : vector<8x1xf32> to vector<8x8xf32>
    %126 = arith.divf %122, %125 : vector<8x8xf32>
    %127 = arith.truncf %126 : vector<8x8xf32> to vector<8x8xbf16>
    %cst_60 = arith.constant dense<0.000000e+00> : vector<8x8xf32>
    %128 = tpu.matmul %127, %113, %cst_60 {dimension_numbers = #tpu.dot_dimension_numbers<[1], [0], [0], [1], [0, 0, 1, 1], [], []>} : vector<8x8xbf16>, vector<8x8xbf16>, vector<8x8xf32> -> vector<8x8xf32>
    %c8_61 = arith.constant 8 : index
    %c0_62 = arith.constant 0 : index
    %129 = vector.load %arg20[%c8_61, %c0_62] : memref<16x32xf32, #tpu.memory_space<vmem>>, vector<8x8xf32>
    tpu.vector_store %arg20[%c8_61, %c0_62], %128 {strides = array<i32>} : memref<16x32xf32, #tpu.memory_space<vmem>>, vector<8x8xf32>,
    %130 = vector.extract_strided_slice %22 {offsets = [8, 8], sizes = [8, 8], strides = [1, 1]} : vector<16x32xbf16> to vector<8x8xbf16>
    %131 = vector.extract_strided_slice %28 {offsets = [8, 8], sizes = [8, 8], strides = [1, 1]} : vector<16x32xbf16> to vector<8x8xbf16>
    %132 = vector.extract_strided_slice %34 {offsets = [8, 8], sizes = [8, 8], strides = [1, 1]} : vector<16x32xbf16> to vector<8x8xbf16>
    %133 = tpu.transpose %131, [1, 0] : vector<8x8xbf16> -> vector<8x8xbf16>
    %cst_63 = arith.constant dense<0.000000e+00> : vector<8x8xf32>
    %134 = tpu.matmul %130, %133, %cst_63 {dimension_numbers = #tpu.dot_dimension_numbers<[1], [0], [0], [1], [0, 0, 1, 1], [], []>} : vector<8x8xbf16>, vector<8x8xbf16>, vector<8x8xf32> -> vector<8x8xf32>
    %cst_64 = arith.constant 0.353553385 : f32
    %135 = vector.broadcast %cst_64 : f32 to vector<8x8xf32>
    %136 = arith.mulf %134, %135 : vector<8x8xf32>
    %cst_65 = arith.constant dense<0xFF800000> : vector<8xf32>
    %137 = vector.multi_reduction <maximumf>, %136, %cst_65 [1] : vector<8x8xf32> to vector<8xf32>
    %138 = vector.shape_cast %137 : vector<8xf32> to vector<8x1xf32>
    %139 = vector.broadcast %138 : vector<8x1xf32> to vector<8x8xf32>
    %140 = arith.subf %136, %139 : vector<8x8xf32>
    %141 = math.exp %140 : vector<8x8xf32>
    %cst_66 = arith.constant dense<0.000000e+00> : vector<8xf32>
    %142 = vector.multi_reduction <add>, %141, %cst_66 [1] : vector<8x8xf32> to vector<8xf32>
    %143 = vector.shape_cast %142 : vector<8xf32> to vector<8x1xf32>
    %144 = vector.broadcast %143 : vector<8x1xf32> to vector<8x8xf32>
    %145 = arith.divf %141, %144 : vector<8x8xf32>
    %146 = arith.truncf %145 : vector<8x8xf32> to vector<8x8xbf16>
    %cst_67 = arith.constant dense<0.000000e+00> : vector<8x8xf32>
    %147 = tpu.matmul %146, %132, %cst_67 {dimension_numbers = #tpu.dot_dimension_numbers<[1], [0], [0], [1], [0, 0, 1, 1], [], []>} : vector<8x8xbf16>, vector<8x8xbf16>, vector<8x8xf32> -> vector<8x8xf32>
    %c8_68 = arith.constant 8 : index
    %c8_69 = arith.constant 8 : index
    %148 = vector.load %arg20[%c8_68, %c8_69] : memref<16x32xf32, #tpu.memory_space<vmem>>, vector<8x8xf32>
    tpu.vector_store %arg20[%c8_68, %c8_69], %147 {strides = array<i32>} : memref<16x32xf32, #tpu.memory_space<vmem>>, vector<8x8xf32>,
    %149 = vector.extract_strided_slice %22 {offsets = [8, 16], sizes = [8, 8], strides = [1, 1]} : vector<16x32xbf16> to vector<8x8xbf16>
    %150 = vector.extract_strided_slice %28 {offsets = [8, 16], sizes = [8, 8], strides = [1, 1]} : vector<16x32xbf16> to vector<8x8xbf16>
    %151 = vector.extract_strided_slice %34 {offsets = [8, 16], sizes = [8, 8], strides = [1, 1]} : vector<16x32xbf16> to vector<8x8xbf16>
    %152 = tpu.transpose %150, [1, 0] : vector<8x8xbf16> -> vector<8x8xbf16>
    %cst_70 = arith.constant dense<0.000000e+00> : vector<8x8xf32>
    %153 = tpu.matmul %149, %152, %cst_70 {dimension_numbers = #tpu.dot_dimension_numbers<[1], [0], [0], [1], [0, 0, 1, 1], [], []>} : vector<8x8xbf16>, vector<8x8xbf16>, vector<8x8xf32> -> vector<8x8xf32>
    %cst_71 = arith.constant 0.353553385 : f32
    %154 = vector.broadcast %cst_71 : f32 to vector<8x8xf32>
    %155 = arith.mulf %153, %154 : vector<8x8xf32>
    %cst_72 = arith.constant dense<0xFF800000> : vector<8xf32>
    %156 = vector.multi_reduction <maximumf>, %155, %cst_72 [1] : vector<8x8xf32> to vector<8xf32>
    %157 = vector.shape_cast %156 : vector<8xf32> to vector<8x1xf32>
    %158 = vector.broadcast %157 : vector<8x1xf32> to vector<8x8xf32>
    %159 = arith.subf %155, %158 : vector<8x8xf32>
    %160 = math.exp %159 : vector<8x8xf32>
    %cst_73 = arith.constant dense<0.000000e+00> : vector<8xf32>
    %161 = vector.multi_reduction <add>, %160, %cst_73 [1] : vector<8x8xf32> to vector<8xf32>
    %162 = vector.shape_cast %161 : vector<8xf32> to vector<8x1xf32>
    %163 = vector.broadcast %162 : vector<8x1xf32> to vector<8x8xf32>
    %164 = arith.divf %160, %163 : vector<8x8xf32>
    %165 = arith.truncf %164 : vector<8x8xf32> to vector<8x8xbf16>
    %cst_74 = arith.constant dense<0.000000e+00> : vector<8x8xf32>
    %166 = tpu.matmul %165, %151, %cst_74 {dimension_numbers = #tpu.dot_dimension_numbers<[1], [0], [0], [1], [0, 0, 1, 1], [], []>} : vector<8x8xbf16>, vector<8x8xbf16>, vector<8x8xf32> -> vector<8x8xf32>
    %c8_75 = arith.constant 8 : index
    %c16_76 = arith.constant 16 : index
    %167 = vector.load %arg20[%c8_75, %c16_76] : memref<16x32xf32, #tpu.memory_space<vmem>>, vector<8x8xf32>
    tpu.vector_store %arg20[%c8_75, %c16_76], %166 {strides = array<i32>} : memref<16x32xf32, #tpu.memory_space<vmem>>, vector<8x8xf32>,
    %168 = vector.extract_strided_slice %22 {offsets = [8, 24], sizes = [8, 8], strides = [1, 1]} : vector<16x32xbf16> to vector<8x8xbf16>
    %169 = vector.extract_strided_slice %28 {offsets = [8, 24], sizes = [8, 8], strides = [1, 1]} : vector<16x32xbf16> to vector<8x8xbf16>
    %170 = vector.extract_strided_slice %34 {offsets = [8, 24], sizes = [8, 8], strides = [1, 1]} : vector<16x32xbf16> to vector<8x8xbf16>
    %171 = tpu.transpose %169, [1, 0] : vector<8x8xbf16> -> vector<8x8xbf16>
    %cst_77 = arith.constant dense<0.000000e+00> : vector<8x8xf32>
    %172 = tpu.matmul %168, %171, %cst_77 {dimension_numbers = #tpu.dot_dimension_numbers<[1], [0], [0], [1], [0, 0, 1, 1], [], []>} : vector<8x8xbf16>, vector<8x8xbf16>, vector<8x8xf32> -> vector<8x8xf32>
    %cst_78 = arith.constant 0.353553385 : f32
    %173 = vector.broadcast %cst_78 : f32 to vector<8x8xf32>
    %174 = arith.mulf %172, %173 : vector<8x8xf32>
    %cst_79 = arith.constant dense<0xFF800000> : vector<8xf32>
    %175 = vector.multi_reduction <maximumf>, %174, %cst_79 [1] : vector<8x8xf32> to vector<8xf32>
    %176 = vector.shape_cast %175 : vector<8xf32> to vector<8x1xf32>
    %177 = vector.broadcast %176 : vector<8x1xf32> to vector<8x8xf32>
    %178 = arith.subf %174, %177 : vector<8x8xf32>
    %179 = math.exp %178 : vector<8x8xf32>
    %cst_80 = arith.constant dense<0.000000e+00> : vector<8xf32>
    %180 = vector.multi_reduction <add>, %179, %cst_80 [1] : vector<8x8xf32> to vector<8xf32>
    %181 = vector.shape_cast %180 : vector<8xf32> to vector<8x1xf32>
    %182 = vector.broadcast %181 : vector<8x1xf32> to vector<8x8xf32>
    %183 = arith.divf %179, %182 : vector<8x8xf32>
    %184 = arith.truncf %183 : vector<8x8xf32> to vector<8x8xbf16>
    %cst_81 = arith.constant dense<0.000000e+00> : vector<8x8xf32>
    %185 = tpu.matmul %184, %170, %cst_81 {dimension_numbers = #tpu.dot_dimension_numbers<[1], [0], [0], [1], [0, 0, 1, 1], [], []>} : vector<8x8xbf16>, vector<8x8xbf16>, vector<8x8xf32> -> vector<8x8xf32>
    %c8_82 = arith.constant 8 : index
    %c24_83 = arith.constant 24 : index
    %186 = vector.load %arg20[%c8_82, %c24_83] : memref<16x32xf32, #tpu.memory_space<vmem>>, vector<8x8xf32>
    tpu.vector_store %arg20[%c8_82, %c24_83], %185 {strides = array<i32>} : memref<16x32xf32, #tpu.memory_space<vmem>>, vector<8x8xf32>,
    %c0_84 = arith.constant 0 : index
    %c0_85 = arith.constant 0 : index
    %187 = vector.load %arg20[%c0_84, %c0_85] : memref<16x32xf32, #tpu.memory_space<vmem>>, vector<16x32xf32>
    %188 = arith.truncf %187 : vector<16x32xf32> to vector<16x32xbf16>
    %cst_86 = arith.constant dense<0.000000e+00> : vector<16x32xf32>
    %189 = tpu.matmul %188, %12, %cst_86 {dimension_numbers = #tpu.dot_dimension_numbers<[1], [0], [0], [1], [0, 0, 1, 1], [], []>} : vector<16x32xbf16>, vector<32x32xbf16>, vector<16x32xf32> -> vector<16x32xf32>
    %c0_87 = arith.constant 0 : index
    %c0_88 = arith.constant 0 : index
    %c0_89 = arith.constant 0 : index
    %190 = vector.load %arg9[%c0_87, %c0_88, %c0_89] : memref<1x1x32xf32, #tpu.memory_space<vmem>>, vector<1x1x32xf32>
    %191 = vector.shape_cast %190 : vector<1x1x32xf32> to vector<1x32xf32>
    %192 = vector.broadcast %191 : vector<1x32xf32> to vector<16x32xf32>
    %193 = arith.addf %189, %192 : vector<16x32xf32>
    %194 = arith.addf %3, %193 : vector<16x32xf32>
    %cst_90 = arith.constant dense<0.000000e+00> : vector<16xf32>
    %195 = vector.multi_reduction <add>, %194, %cst_90 [1] : vector<16x32xf32> to vector<16xf32>
    %196 = vector.shape_cast %195 : vector<16xf32> to vector<16x1xf32>
    %cst_91 = arith.constant 3.200000e+01 : f32
    %197 = vector.broadcast %cst_91 : f32 to vector<16x1xf32>
    %198 = arith.divf %196, %197 : vector<16x1xf32>
    %199 = vector.broadcast %198 : vector<16x1xf32> to vector<16x32xf32>
    %200 = arith.subf %194, %199 : vector<16x32xf32>
    %201 = arith.mulf %200, %200 : vector<16x32xf32>
    %cst_92 = arith.constant dense<0.000000e+00> : vector<16xf32>
    %202 = vector.multi_reduction <add>, %201, %cst_92 [1] : vector<16x32xf32> to vector<16xf32>
    %203 = vector.shape_cast %202 : vector<16xf32> to vector<16x1xf32>
    %cst_93 = arith.constant 3.200000e+01 : f32
    %204 = vector.broadcast %cst_93 : f32 to vector<16x1xf32>
    %205 = arith.divf %203, %204 : vector<16x1xf32>
    %206 = vector.broadcast %198 : vector<16x1xf32> to vector<16x32xf32>
    %207 = arith.subf %194, %206 : vector<16x32xf32>
    %cst_94 = arith.constant 9.99999974E-6 : f32
    %208 = vector.broadcast %cst_94 : f32 to vector<16x1xf32>
    %209 = arith.addf %205, %208 : vector<16x1xf32>
    %210 = math.rsqrt %209 : vector<16x1xf32>
    %211 = vector.broadcast %210 : vector<16x1xf32> to vector<16x32xf32>
    %212 = arith.mulf %207, %211 : vector<16x32xf32>
    %c0_95 = arith.constant 0 : index
    %c0_96 = arith.constant 0 : index
    %c0_97 = arith.constant 0 : index
    %213 = vector.load %arg10[%c0_95, %c0_96, %c0_97] : memref<1x1x32xf32, #tpu.memory_space<vmem>>, vector<1x1x32xf32>
    %214 = vector.shape_cast %213 : vector<1x1x32xf32> to vector<1x32xf32>
    %215 = vector.broadcast %214 : vector<1x32xf32> to vector<16x32xf32>
    %216 = arith.mulf %212, %215 : vector<16x32xf32>
    %c0_98 = arith.constant 0 : index
    %c0_99 = arith.constant 0 : index
    %c0_100 = arith.constant 0 : index
    %217 = vector.load %arg11[%c0_98, %c0_99, %c0_100] : memref<1x1x32xf32, #tpu.memory_space<vmem>>, vector<1x1x32xf32>
    %218 = vector.shape_cast %217 : vector<1x1x32xf32> to vector<1x32xf32>
    %219 = vector.broadcast %218 : vector<1x32xf32> to vector<16x32xf32>
    %220 = arith.addf %216, %219 : vector<16x32xf32>
    %221 = arith.truncf %220 : vector<16x32xf32> to vector<16x32xbf16>
    %cst_101 = arith.constant dense<0.000000e+00> : vector<16x64xf32>
    %222 = tpu.matmul %221, %14, %cst_101 {dimension_numbers = #tpu.dot_dimension_numbers<[1], [0], [0], [1], [0, 0, 1, 1], [], []>} : vector<16x32xbf16>, vector<32x64xbf16>, vector<16x64xf32> -> vector<16x64xf32>
    %c0_102 = arith.constant 0 : index
    %c0_103 = arith.constant 0 : index
    %c0_104 = arith.constant 0 : index
    %223 = vector.load %arg13[%c0_102, %c0_103, %c0_104] : memref<1x1x64xf32, #tpu.memory_space<vmem>>, vector<1x1x64xf32>
    %224 = vector.shape_cast %223 : vector<1x1x64xf32> to vector<1x64xf32>
    %225 = vector.broadcast %224 : vector<1x64xf32> to vector<16x64xf32>
    %226 = arith.addf %222, %225 : vector<16x64xf32>
    %cst_105 = arith.constant 5.000000e-01 : f32
    %227 = vector.broadcast %cst_105 : f32 to vector<16x64xf32>
    %228 = arith.mulf %227, %226 : vector<16x64xf32>
    %229 = arith.mulf %226, %226 : vector<16x64xf32>
    %230 = arith.mulf %226, %229 : vector<16x64xf32>
    %cst_106 = arith.constant 4.471500e-02 : f32
    %231 = vector.broadcast %cst_106 : f32 to vector<16x64xf32>
    %232 = arith.mulf %231, %230 : vector<16x64xf32>
    %233 = arith.addf %226, %232 : vector<16x64xf32>
    %cst_107 = arith.constant 0.797884583 : f32
    %234 = vector.broadcast %cst_107 : f32 to vector<16x64xf32>
    %235 = arith.mulf %234, %233 : vector<16x64xf32>
    %236 = math.tanh %235 : vector<16x64xf32>
    %cst_108 = arith.constant 1.000000e+00 : f32
    %237 = vector.broadcast %cst_108 : f32 to vector<16x64xf32>
    %238 = arith.addf %237, %236 : vector<16x64xf32>
    %239 = arith.mulf %228, %238 : vector<16x64xf32>
    %240 = arith.truncf %239 : vector<16x64xf32> to vector<16x64xbf16>
    %cst_109 = arith.constant dense<0.000000e+00> : vector<16x32xf32>
    %241 = tpu.matmul %240, %16, %cst_109 {dimension_numbers = #tpu.dot_dimension_numbers<[1], [0], [0], [1], [0, 0, 1, 1], [], []>} : vector<16x64xbf16>, vector<64x32xbf16>, vector<16x32xf32> -> vector<16x32xf32>
    %c0_110 = arith.constant 0 : index
    %c0_111 = arith.constant 0 : index
    %c0_112 = arith.constant 0 : index
    %242 = vector.load %arg15[%c0_110, %c0_111, %c0_112] : memref<1x1x32xf32, #tpu.memory_space<vmem>>, vector<1x1x32xf32>
    %243 = vector.shape_cast %242 : vector<1x1x32xf32> to vector<1x32xf32>
    %244 = vector.broadcast %243 : vector<1x32xf32> to vector<16x32xf32>
    %245 = arith.addf %241, %244 : vector<16x32xf32>
    %246 = arith.addf %220, %245 : vector<16x32xf32>
    %cst_113 = arith.constant dense<0.000000e+00> : vector<16xf32>
    %247 = vector.multi_reduction <add>, %246, %cst_113 [1] : vector<16x32xf32> to vector<16xf32>
    %248 = vector.shape_cast %247 : vector<16xf32> to vector<16x1xf32>
    %cst_114 = arith.constant 3.200000e+01 : f32
    %249 = vector.broadcast %cst_114 : f32 to vector<16x1xf32>
    %250 = arith.divf %248, %249 : vector<16x1xf32>
    %251 = vector.broadcast %250 : vector<16x1xf32> to vector<16x32xf32>
    %252 = arith.subf %246, %251 : vector<16x32xf32>
    %253 = arith.mulf %252, %252 : vector<16x32xf32>
    %cst_115 = arith.constant dense<0.000000e+00> : vector<16xf32>
    %254 = vector.multi_reduction <add>, %253, %cst_115 [1] : vector<16x32xf32> to vector<16xf32>
    %255 = vector.shape_cast %254 : vector<16xf32> to vector<16x1xf32>
    %cst_116 = arith.constant 3.200000e+01 : f32
    %256 = vector.broadcast %cst_116 : f32 to vector<16x1xf32>
    %257 = arith.divf %255, %256 : vector<16x1xf32>
    %258 = vector.broadcast %250 : vector<16x1xf32> to vector<16x32xf32>
    %259 = arith.subf %246, %258 : vector<16x32xf32>
    %cst_117 = arith.constant 9.99999974E-6 : f32
    %260 = vector.broadcast %cst_117 : f32 to vector<16x1xf32>
    %261 = arith.addf %257, %260 : vector<16x1xf32>
    %262 = math.rsqrt %261 : vector<16x1xf32>
    %263 = vector.broadcast %262 : vector<16x1xf32> to vector<16x32xf32>
    %264 = arith.mulf %259, %263 : vector<16x32xf32>
    %c0_118 = arith.constant 0 : index
    %c0_119 = arith.constant 0 : index
    %c0_120 = arith.constant 0 : index
    %265 = vector.load %arg16[%c0_118, %c0_119, %c0_120] : memref<1x1x32xf32, #tpu.memory_space<vmem>>, vector<1x1x32xf32>
    %266 = vector.shape_cast %265 : vector<1x1x32xf32> to vector<1x32xf32>
    %267 = vector.broadcast %266 : vector<1x32xf32> to vector<16x32xf32>
    %268 = arith.mulf %264, %267 : vector<16x32xf32>
    %c0_121 = arith.constant 0 : index
    %c0_122 = arith.constant 0 : index
    %c0_123 = arith.constant 0 : index
    %269 = vector.load %arg17[%c0_121, %c0_122, %c0_123] : memref<1x1x32xf32, #tpu.memory_space<vmem>>, vector<1x1x32xf32>
    %270 = vector.shape_cast %269 : vector<1x1x32xf32> to vector<1x32xf32>
    %271 = vector.broadcast %270 : vector<1x32xf32> to vector<16x32xf32>
    %272 = arith.addf %268, %271 : vector<16x32xf32>
    %c0_124 = arith.constant 0 : index
    %c0_125 = arith.constant 0 : index
    %273 = vector.load %arg19[%c0_124, %c0_125] : memref<16x32xf32, #tpu.memory_space<vmem>>, vector<16x32xf32>
    tpu.vector_store %arg19[%c0_124, %c0_125], %272 {strides = array<i32>} : memref<16x32xf32, #tpu.memory_space<vmem>>, vector<16x32xf32>,
    %c1_i32 = arith.constant 1 : i32
    %274 = arith.cmpi eq, %arg0, %c1_i32 : i32
    %275 = arith.extui %274 : i1 to i32
    %c0_i32_126 = arith.constant 0 : i32
    %276 = arith.cmpi ne, %275, %c0_i32_126 : i32
    scf.if %276 {
      %c0_127 = arith.constant 0 : index
      %c0_128 = arith.constant 0 : index
      %277 = vector.load %arg18[%c0_127, %c0_128] : memref<16x32xf32, #tpu.memory_space<vmem>>, vector<16x32xf32>
      tpu.vector_store %arg18[%c0_127, %c0_128], %272 {strides = array<i32>} : memref<16x32xf32, #tpu.memory_space<vmem>>, vector<16x32xf32>,
    } else {
    }
    return
  }
  func.func @transform_0(%arg0: i32) -> (i32, i32) {
    %c0_i32 = arith.constant 0 : i32
    %c0_i32_0 = arith.constant 0 : i32
    %c0_i32_1 = arith.constant 0 : i32
    return %c0_i32, %c0_i32_0 : i32, i32
  }
  func.func @transform_1(%arg0: i32) -> (i32, i32, i32) {
    %c0_i32 = arith.constant 0 : i32
    %c0_i32_0 = arith.constant 0 : i32
    %c0_i32_1 = arith.constant 0 : i32
    return %arg0, %c0_i32, %c0_i32_0 : i32, i32, i32
  }
  func.func @transform_2(%arg0: i32) -> (i32, i32, i32) {
    %c0_i32 = arith.constant 0 : i32
    %c0_i32_0 = arith.constant 0 : i32
    %c0_i32_1 = arith.constant 0 : i32
    return %arg0, %c0_i32, %c0_i32_0 : i32, i32, i32
  }
  func.func @transform_3(%arg0: i32) -> (i32, i32, i32) {
    %c0_i32 = arith.constant 0 : i32
    %c0_i32_0 = arith.constant 0 : i32
    %c0_i32_1 = arith.constant 0 : i32
    return %arg0, %c0_i32, %c0_i32_0 : i32, i32, i32
  }
  func.func @transform_4(%arg0: i32) -> (i32, i32, i32) {
    %c0_i32 = arith.constant 0 : i32
    %c0_i32_0 = arith.constant 0 : i32
    %c0_i32_1 = arith.constant 0 : i32
    return %arg0, %c0_i32, %c0_i32_0 : i32, i32, i32
  }
  func.func @transform_5(%arg0: i32) -> (i32, i32, i32) {
    %c0_i32 = arith.constant 0 : i32
    %c0_i32_0 = arith.constant 0 : i32
    %c0_i32_1 = arith.constant 0 : i32
    return %arg0, %c0_i32, %c0_i32_0 : i32, i32, i32
  }
  func.func @transform_6(%arg0: i32) -> (i32, i32, i32) {
    %c0_i32 = arith.constant 0 : i32
    %c0_i32_0 = arith.constant 0 : i32
    %c0_i32_1 = arith.constant 0 : i32
    return %arg0, %c0_i32, %c0_i32_0 : i32, i32, i32
  }
  func.func @transform_7(%arg0: i32) -> (i32, i32, i32) {
    %c0_i32 = arith.constant 0 : i32
    %c0_i32_0 = arith.constant 0 : i32
    %c0_i32_1 = arith.constant 0 : i32
    return %arg0, %c0_i32, %c0_i32_0 : i32, i32, i32
  }
  func.func @transform_8(%arg0: i32) -> (i32, i32, i32) {
    %c0_i32 = arith.constant 0 : i32
    %c0_i32_0 = arith.constant 0 : i32
    %c0_i32_1 = arith.constant 0 : i32
    return %arg0, %c0_i32, %c0_i32_0 : i32, i32, i32
  }
  func.func @transform_9(%arg0: i32) -> (i32, i32, i32) {
    %c0_i32 = arith.constant 0 : i32
    %c0_i32_0 = arith.constant 0 : i32
    %c0_i32_1 = arith.constant 0 : i32
    return %arg0, %c0_i32, %c0_i32_0 : i32, i32, i32
  }
  func.func @transform_10(%arg0: i32) -> (i32, i32, i32) {
    %c0_i32 = arith.constant 0 : i32
    %c0_i32_0 = arith.constant 0 : i32
    %c0_i32_1 = arith.constant 0 : i32
    return %arg0, %c0_i32, %c0_i32_0 : i32, i32, i32
  }
  func.func @transform_11(%arg0: i32) -> (i32, i32, i32) {
    %c0_i32 = arith.constant 0 : i32
    %c0_i32_0 = arith.constant 0 : i32
    %c0_i32_1 = arith.constant 0 : i32
    return %arg0, %c0_i32, %c0_i32_0 : i32, i32, i32
  }
  func.func @transform_12(%arg0: i32) -> (i32, i32, i32) {
    %c0_i32 = arith.constant 0 : i32
    %c0_i32_0 = arith.constant 0 : i32
    %c0_i32_1 = arith.constant 0 : i32
    return %arg0, %c0_i32, %c0_i32_0 : i32, i32, i32
  }
  func.func @transform_13(%arg0: i32) -> (i32, i32, i32) {
    %c0_i32 = arith.constant 0 : i32
    %c0_i32_0 = arith.constant 0 : i32
    %c0_i32_1 = arith.constant 0 : i32
    return %arg0, %c0_i32, %c0_i32_0 : i32, i32, i32
  }
  func.func @transform_14(%arg0: i32) -> (i32, i32, i32) {
    %c0_i32 = arith.constant 0 : i32
    %c0_i32_0 = arith.constant 0 : i32
    %c0_i32_1 = arith.constant 0 : i32
    return %arg0, %c0_i32, %c0_i32_0 : i32, i32, i32
  }
  func.func @transform_15(%arg0: i32) -> (i32, i32, i32) {
    %c0_i32 = arith.constant 0 : i32
    %c0_i32_0 = arith.constant 0 : i32
    %c0_i32_1 = arith.constant 0 : i32
    return %arg0, %c0_i32, %c0_i32_0 : i32, i32, i32
  }
  func.func @transform_16(%arg0: i32) -> (i32, i32, i32) {
    %c0_i32 = arith.constant 0 : i32
    %c0_i32_0 = arith.constant 0 : i32
    %c0_i32_1 = arith.constant 0 : i32
    return %arg0, %c0_i32, %c0_i32_0 : i32, i32, i32
  }
  func.func @transform_17(%arg0: i32) -> (i32, i32) {
    %c0_i32 = arith.constant 0 : i32
    %c0_i32_0 = arith.constant 0 : i32
    %c0_i32_1 = arith.constant 0 : i32
    return %c0_i32, %c0_i32_0 : i32, i32
  }
}

</mosaic_0001>

<bundles_post_ra>
// kernel: tpu_custom_call.1
= control target key start
LH: loop header
LB: loop body
LE: loop exit
PB: predicated region body
PF: predicated region fallthrough
CT: control target
= control target key end

     0   :  { %s3307_s0 = inlined_call_operand.hbm [shape: f32[16,32], index: 0, kind: input, shape index: {}]   ;;  %s3308_s1 = inlined_call_operand.vmem [shape: bf16[2,32,32], index: 1, kind: input, shape index: {}]   ;;  %s3309_s2 = inlined_call_operand.hbm [shape: f32[2,1,32], index: 2, kind: input, shape index: {}]   ;;  %s3310_s3 = inlined_call_operand.vmem [shape: bf16[2,32,32], index: 3, kind: input, shape index: {}]   ;;  %s3311_s4 = inlined_call_operand.vmem [shape: f32[2,1,32], index: 4, kind: input, shape index: {}]   ;;  %s3312_s5 = inlined_call_operand.vmem [shape: bf16[2,32,32], index: 5, kind: input, shape index: {}]   ;;  %s3313_s6 = inlined_call_operand.vmem [shape: f32[2,1,32], index: 6, kind: input, shape index: {}]   ;;  %s3314_s7 = inlined_call_operand.hbm [shape: bf16[2,32,32], index: 7, kind: input, shape index: {}]   ;;  %s3315_s8 = inlined_call_operand.vmem [shape: f32[2,1,32], index: 8, kind: input, shape index: {}]   ;;  %s3316_s9 = inlined_call_operand.hbm [shape: f32[2,1,32], index: 9, kind: input, shape index: {}]   ;;  %s3317_s10 = inlined_call_operand.vmem [shape: f32[2,1,32], index: 10, kind: input, shape index: {}]   ;;  %s3318_s11 = inlined_call_operand.hbm [shape: bf16[2,32,64], index: 11, kind: input, shape index: {}]   ;;  %s3319_s12 = inlined_call_operand.vmem [shape: f32[2,1,64], index: 12, kind: input, shape index: {}]   ;;  %s3320_s13 = inlined_call_operand.vmem [shape: bf16[2,64,32], index: 13, kind: input, shape index: {}]   ;;  %s3321_s14 = inlined_call_operand.vmem [shape: f32[2,1,32], index: 14, kind: input, shape index: {}]   ;;  %s3322_s15 = inlined_call_operand.hbm [shape: f32[2,1,32], index: 15, kind: input, shape index: {}]   ;;  %s3323_s16 = inlined_call_operand.vmem [shape: f32[2,1,32], index: 16, kind: input, shape index: {}]   ;;  %s3324_s17 = inlined_call_operand.hbm [shape: f32[16,32], index: 17, kind: output, shape index: {}]  }
   0x1   :  { %3328 = sst [smem:[#allocation24_spill]] %s3307_s0 }
   0x2   :  { %3329 = sst [smem:[#allocation25_spill]] %s3308_s1 }
   0x3   :  { %3330 = sst [smem:[#allocation26_spill]] %s3309_s2 }
   0x4   :  { %3331 = sst [smem:[#allocation27_spill]] %s3310_s3 }
   0x5   :  { %3332 = sst [smem:[#allocation28_spill]] %s3312_s5 }
   0x6   :  { %3333 = sst [smem:[#allocation29_spill]] %s3313_s6 }
   0x7   :  { %3334 = sst [smem:[#allocation30_spill]] %s3314_s7 }
   0x8   :  { %3335 = sst [smem:[#allocation31_spill]] %s3315_s8 }
   0x9   :  { %3336 = sst [smem:[#allocation32_spill]] %s3316_s9 }
   0xa   :  { %3337 = sst [smem:[#allocation33_spill]] %s3317_s10 }
   0xb   :  { %3338 = sst [smem:[#allocation34_spill]] %s3318_s11 }
   0xc   :  { %3339 = sst [smem:[#allocation35_spill]] %s3319_s12 }
   0xd   :  { %3340 = sst [smem:[#allocation36_spill]] %s3320_s13 }
   0xe   :  { %3341 = sst [smem:[#allocation37_spill]] %s3321_s14 }
   0xf   :  { %3342 = sst [smem:[#allocation38_spill]] %s3322_s15 }
  0x10   :  { %3343 = sst [smem:[#allocation39_spill]] %s3323_s16 }
  0x11   :  { %3344 = sst [smem:[#allocation40_spill]] %s3324_s17 }
  0x12   :  { %22 = vsyncpa [#allocation5], 0 }
  0x13   :  { %23 = vsyncpa [#allocation8], 0 }
  0x14   :  { %25 = vsyncpa [#allocation8 + $0x1], 0 }
  0x15   :  { %26 = vsyncpa [#allocation11], 0 }
  0x16   :  { %28 = vsyncpa [#allocation11 + $0x1], 0 }
  0x17   :  { %29 = vsyncpa [#allocation14], 0 }
  0x18   :  { %31 = vsyncpa [#allocation14 + $0x1], 0 }
  0x19   :  { %32 = vsyncpa [#allocation6], 0  ;;  %s2796_s24 = smov 0   ;;  %s2798_s25 = smov 0  }
  0x1a   :  { %s2800_s26 = smov 0   ;;  %s2802_s27 = smov 0  }
  0x1b LB: > { %3345 = sst [smem:[#allocation21_spill]] %s2686_s26  ;;  %s2817_s28 = sadd.s32 1, %s2690_s27   ;;  %s2690_s27 = sphi %s2802_s27, %s3383_s27   ;;  %s2686_s26 = sphi %s2800_s26, %s3385_s26   ;;  %s2682_s25 = sphi %s2798_s25, %s3387_s25   ;;  %s2678_s24 = sphi %s2796_s24, %s3386_s24  }
  0x1c   : > { %3346 = sst [smem:[#allocation22_spill]] %s2817_s28  ;;  %s92_s29 = sadd.s32 1, %s2686_s26 }
  0x1d   : > { %s89_s0 = ssub.s32 %s2690_s27, %s2817_s28  ;;  %p99_p0 = scmp.ne.s32.totalorder %s2686_s26, %s2682_s25 }
  0x1e   : > { %p90_p1 = scmp.eq.s32.totalorder %s89_s0, 0  ;;  %p100_p2 = scmp.eq.s32.totalorder %s2690_s27, 0 }
  0x1f   : > { %p2326_p3 = scmp.lt.s32.totalorder %s2690_s27, 2  ;;  %s2831_s19 = sand.u32 1, %s2686_s26  }
  0x20   : > { %s2827_s30 = scalar_select %p90_p1, %s2686_s26, %s92_s29  }
  0x21   : > { %p101_p4 = por %p100_p2, %p99_p0  ;;  %s3348_s2 = sld [smem:[#allocation26_spill]] }
  0x22   : > { %3347 = sst [smem:[#allocation23_spill]] %s2827_s30  ;;  %s539_s23 = scalar_lea.vmem [#allocation7], %s2831_s19 }
  0x23   : > { %s546_s28 = sshll.u32 %s539_s23, 4  ;;  %p2838_p5 = pnand %p2326_p3, %p101_p4  ;;  %s547_s28 = int_to_ptr.vmem [resolvable:$true] %s546_s28 }
  0x24   : > { %s3350_s9 = sld [smem:[#allocation32_spill]]  ;;  %s3351_s17 = sand.u32 1, %s2690_s27  }
  0x25   : > { %s2850_s1 = scalar_lea.sflag [#allocation8], %s3351_s17  ;;  %p2854_p7 = pneg %p2838_p5 }
  0x27   : > { %s542_s21 = scalar_lea.hbm %s3348_s2, %s2690_s27 }
  0x28   : > { %s544_s22 = sshll.u32 %s542_s21, 4  ;;  %s545_s22 = int_to_ptr.hbm [resolvable:$true] %s544_s22 }
  0x29   : > { %s2432_s20 = sshra.s32 %s545_s22, 4  ;;  %s2433_s20 = int_to_ptr.hbm [resolvable:$true] %s2432_s20 }
  0x2a   : > { %s615_s18 = scalar_lea.hbm %s3350_s9, %s2690_s27  ;;  %s2434_s21 = scalar_lea.hbm %s2433_s20, 1 }
  0x2b   : > { %s2846_s26 = sshll.u32 %s615_s18, 4  ;;  %p2435_p6 = scmp.ne.s32.totalorder %s2433_s20, %s2434_s21  ;;  %s618_s26 = int_to_ptr.hbm [resolvable:$true] %s2846_s26 }
  0x2c   : > { %s2439_s18 = scalar_lea.hbm %s3348_s2, 2  ;;  %p2440_p10 = scmp.lt.s32.totalorder %s2433_s20, %s3348_s2 }
  0x2d   : > { %p2437_p8 = pnand %p2854_p7, %p2435_p6  ;;  %p2441_p11 = scmp.lt.s32.totalorder %s2439_s18, %s2434_s21 }
  0x2f   : > { %p2438_p9 = pneg %p2437_p8  ;;  %p2442_p12 = por %p2441_p11, %p2440_p10 }
  0x31   : > { %p2443_p13 = pnand %p2442_p12, %p2438_p9 }
  0x33   : > { %2446 = shalt.err (!%p2443_p13)
}
  0x34   : > { %2312 = dma.hbm_to_vmem [thread:$0]  (!%p2838_p5), %s545_s22, 16, %s547_s28, %s2850_s1  }
  0x35   : > { %s612_s14 = scalar_lea.vmem [#allocation10], %s2831_s19  ;;  %s3353_s29 = sand.u32 1, %s2690_s27  }
  0x36   : > { %s619_s30 = sshll.u32 %s612_s14, 4  ;;  %s2873_s13 = scalar_lea.sflag [#allocation11], %s3353_s29  ;;  %s620_s30 = int_to_ptr.vmem [resolvable:$true] %s619_s30 }
  0x37   : > { %s2462_s16 = sshra.s32 %s618_s26, 4  ;;  %s2469_s17 = scalar_lea.hbm %s3350_s9, 2  ;;  %s2463_s16 = int_to_ptr.hbm [resolvable:$true] %s2462_s16 }
  0x38   : > { %s2464_s20 = scalar_lea.hbm %s2463_s16, 1  ;;  %p2470_p3 = scmp.lt.s32.totalorder %s2463_s16, %s3350_s9 }
  0x39   : > { %p2465_p0 = scmp.ne.s32.totalorder %s2463_s16, %s2464_s20  ;;  %p2471_p4 = scmp.lt.s32.totalorder %s2469_s17, %s2464_s20 }
  0x3b   : > { %p2467_p1 = pnand %p2465_p0, %p2854_p7  ;;  %p2472_p6 = por %p2471_p4, %p2470_p3 }
  0x3d   : > { %p2468_p2 = pneg %p2467_p1 }
  0x3f   : > { %p2473_p8 = pnand %p2472_p6, %p2468_p2 }
  0x41   : > { %2476 = shalt.err (!%p2473_p8)
}
  0x42   : > { %2318 = dma.hbm_to_vmem [thread:$0]  (!%p2838_p5), %s618_s26, 16, %s620_s30, %s2873_s13  }
  0x43   : > { %s2887_s14 = sadd.s32 4294967295, %s2690_s27   ;;  %p105_p9 = scmp.ne.s32.totalorder %s2682_s25, %s2678_s24 }
  0x44   : > { %p106_p10 = scmp.eq.s32.totalorder %s2887_s14, 0  ;;  %p2162_p11 = scmp.ge.s32.totalorder %s2690_s27, 1 }
  0x45   : > { %p501_p12 = scmp.lt.s32.totalorder %s2690_s27, 3  ;;  %p2163_p0 = scmp.ne.s32.totalorder %s2887_s14, 0 }
  0x46   : > { %p2896_p13 = por %p106_p10, %p105_p9  ;;  %s3356_s29 = sld [smem:[#allocation24_spill]] }
  0x47   : > { %p2901_p1 = pnand %p2162_p11, %p501_p12  ;;  %s2692_s16 = smov [#allocation4]  }
  0x48   : > { %s514_s20 = sshll.u32 %s2692_s16, 4  ;;  %s2165_s21 = sshll.u32 %s2831_s19, 4  ;;  %s515_s20 = int_to_ptr.vmem [resolvable:$true] %s514_s20 }
  0x49   : > { %p2305_p2 = pneg %p2901_p1  ;;  %s2267_s18 = sshll.u32 %s2690_s27, 4 }
  0x4a   : > { %s2693_s17 = smov 128   ;;  %s2694_s28 = smov 8  }
  0x4b   : > { %p2306_p3 = pnand %p2305_p2, %p106_p10  ;;  %s3357_s7 = sld [smem:[#allocation30_spill]] }
  0x4c   : > { %s512_s24 = sshll.u32 %s3356_s29, 4  ;;  %s585_s30 = scalar_lea.vmem [#allocation9], %s2165_s21  ;;  %s513_s24 = int_to_ptr.hbm [resolvable:$true] %s512_s24 }
  0x4d   : > { %2308 = dma.hbm_to_vmem [thread:$0]  (!%p2306_p3), %s513_s24, 256, %s515_s20, [#allocation5], %s2693_s17, %s2693_s17, %s2694_s28  }
  0x4e   : > { %s593_s29 = sshll.u32 %s585_s30, 4  ;;  %s594_s29 = int_to_ptr.vmem [resolvable:$true] %s593_s29 }
  0x51   : > { %s590_s22 = scalar_lea.hbm %s3357_s7, %s2267_s18  ;;  %s2529_s20 = scalar_lea.hbm %s3357_s7, 32 }
  0x52   : > { %s591_s10 = sshll.u32 %s590_s22, 4  ;;  %s592_s10 = int_to_ptr.hbm [resolvable:$true] %s591_s10 }
  0x53   : > { %s2522_s16 = sshra.s32 %s592_s10, 4  ;;  %s2523_s16 = int_to_ptr.hbm [resolvable:$true] %s2522_s16 }
  0x54   : > { %s2524_s8 = scalar_lea.hbm %s2523_s16, 16  ;;  %p2530_p9 = scmp.lt.s32.totalorder %s2523_s16, %s3357_s7 }
  0x55   : > { %p2525_p4 = scmp.ne.s32.totalorder %s2523_s16, %s2524_s8  ;;  %p2531_p11 = scmp.lt.s32.totalorder %s2529_s20, %s2524_s8 }
  0x57   : > { %p2527_p6 = pnand %p2525_p4, %p2854_p7  ;;  %p2532_p12 = por %p2531_p11, %p2530_p9 }
  0x59   : > { %p2528_p8 = pneg %p2527_p6 }
  0x5b   : > { %p2533_p2 = pnand %p2532_p12, %p2528_p8 }
  0x5d   : > { %2536 = shalt.err (!%p2533_p2)
}
  0x5e   : > { %s2695_s12 = smov 64   ;;  %s2696_s28 = smov 4  }
  0x5f   : > { %2315 = dma.hbm_to_vmem [thread:$0]  (!%p2838_p5), %s592_s10, 256, %s594_s29, %s2850_s1, %s2695_s12, %s2695_s12, %s2696_s28  }
  0x60   : > { %s3358_s11 = sld [smem:[#allocation34_spill]]  ;;  %s636_s16 = scalar_lea.vmem [#allocation12], %s2165_s21 }
  0x61   : > { %s644_s8 = sshll.u32 %s636_s16, 4  ;;  %s645_s8 = int_to_ptr.vmem [resolvable:$true] %s644_s8 }
  0x66   : > { %s641_s30 = scalar_lea.hbm %s3358_s11, %s2267_s18  ;;  %s2559_s1 = scalar_lea.hbm %s3358_s11, 32 }
  0x67   : > { %s642_s24 = sshll.u32 %s641_s30, 4  ;;  %s643_s24 = int_to_ptr.hbm [resolvable:$true] %s642_s24 }
  0x68   : > { %s2552_s20 = sshra.s32 %s643_s24, 4  ;;  %s2553_s20 = int_to_ptr.hbm [resolvable:$true] %s2552_s20 }
  0x69   : > { %s2554_s17 = scalar_lea.hbm %s2553_s20, 16  ;;  %p2560_p8 = scmp.lt.s32.totalorder %s2553_s20, %s3358_s11 }
  0x6a   : > { %p2555_p3 = scmp.ne.s32.totalorder %s2553_s20, %s2554_s17  ;;  %p2561_p9 = scmp.lt.s32.totalorder %s2559_s1, %s2554_s17 }
  0x6c   : > { %p2557_p4 = pnand %p2555_p3, %p2854_p7  ;;  %p2562_p11 = por %p2561_p9, %p2560_p8 }
  0x6e   : > { %p2558_p6 = pneg %p2557_p4 }
  0x70   : > { %p2563_p12 = pnand %p2562_p11, %p2558_p6 }
  0x72   : > { %2566 = shalt.err (!%p2563_p12)
}
  0x73   : > { %2321 = dma.hbm_to_vmem [thread:$0]  (!%p2838_p5), %s643_s24, 256, %s645_s8, %s2873_s13, %s2695_s12, %s2695_s12, %s2696_s28  }
  0x74   : > { %s3359_s15 = sld [smem:[#allocation38_spill]]  ;;  %s677_s16 = scalar_lea.vmem [#allocation13], %s2831_s19 }
  0x75   : > { %s684_s9 = sshll.u32 %s677_s16, 4  ;;  %s675_s20 = scalar_lea.sflag [#allocation14], %s2831_s19  ;;  %s685_s9 = int_to_ptr.vmem [resolvable:$true] %s684_s9 }
  0x7a   : > { %s680_s22 = scalar_lea.hbm %s3359_s15, %s2690_s27  ;;  %s2589_s13 = scalar_lea.hbm %s3359_s15, 2 }
  0x7b   : > { %s682_s30 = sshll.u32 %s680_s22, 4  ;;  %s683_s30 = int_to_ptr.hbm [resolvable:$true] %s682_s30 }
  0x7c   : > { %s2582_s17 = sshra.s32 %s683_s30, 4  ;;  %s2583_s17 = int_to_ptr.hbm [resolvable:$true] %s2582_s17 }
  0x7d   : > { %s2584_s10 = scalar_lea.hbm %s2583_s17, 1  ;;  %p2590_p6 = scmp.lt.s32.totalorder %s2583_s17, %s3359_s15 }
  0x7e   : > { %p2585_p2 = scmp.ne.s32.totalorder %s2583_s17, %s2584_s10  ;;  %p2591_p8 = scmp.lt.s32.totalorder %s2589_s13, %s2584_s10 }
  0x80   : > { %p2587_p3 = pnand %p2585_p2, %p2854_p7  ;;  %p2592_p9 = por %p2591_p8, %p2590_p6 }
  0x82   : > { %p2588_p4 = pneg %p2587_p3 }
  0x84   : > { %p2593_p11 = pnand %p2592_p9, %p2588_p4 }
  0x86   : > { %2596 = shalt.err (!%p2593_p11)
}
  0x87   : > { %2324 = dma.hbm_to_vmem [thread:$0]  (!%p2838_p5), %s683_s30, 16, %s685_s9, %s675_s20  }
  0x88   : > { %699 = sbr.rel (%p2901_p1) target bundleno = 2158 (0x86e), region = 88 }
  0x8d   : > { %2657 = dma.done.wait (%p106_p10), [#allocation5], 256  }
  0x8e   : > { %2659 = vsyncadd (%p106_p10), [#allocation5], 4294967040  ;;  %s706_s27 = sand.u32 1, %s2887_s14   ;;  %s2974_s19 = sand.u32 1, %s2682_s25  }
  0x8f   : > { %s707_s23 = scalar_lea.sflag [#allocation8], %s706_s27 }
  0x90   : > { %2661 = dma.done.wait (%p2896_p13), %s707_s23, 272  }
  0x91   : > { %2663 = vsyncadd (%p2896_p13), %s707_s23, 4294967024  ;;  %s2173_s0 = sshll.u32 %s2974_s19, 4  ;;  %s726_s24 = scalar_lea.sflag [#allocation11], %s706_s27 }
  0x92   : > { %s2982_s26 = scalar_lea.vmem [#allocation9], %s2173_s0 }
  0x93   : > { %2665 = dma.done.wait (%p2896_p13), %s726_s24, 272  }
  0x94   : > { %2667 = vsyncadd (%p2896_p13), %s726_s24, 4294967024  ;;  %s2989_s21 = scalar_lea.vmem [#allocation12], %s2173_s0  ;;  %s745_s18 = scalar_lea.sflag [#allocation14], %s2974_s19 }
  0x95   : > { %2669 = dma.done.wait (%p2896_p13), %s745_s18, 16  }
  0x96   : > { %2671 = vsyncadd (%p2896_p13), %s745_s18, 4294967280  ;;  %p852_p5 = scmp.lt.s32.totalorder %s2887_s14, 1  ;;  %s3360_s1 = sld [smem:[#allocation25_spill]] }
  0x97   : > { %s3361_s3 = sld [smem:[#allocation27_spill]] }
  0x98   : > { %s2999_s30 = scalar_select %p852_p5, %s2887_s14, 1 }
  0x99   : > { %s3362_s5 = sld [smem:[#allocation28_spill]] }
  0x9a   : > { %s2269_s16 = sshll.u32 %s2999_s30, 4  ;;  %s3365_s10 = sld [smem:[#allocation33_spill]] }
  0x9b   : > { %s3366_s12 = sld [smem:[#allocation35_spill]]  ;;  %s2272_s15 = sshll.u32 %s2999_s30, 5 }
  0x9c   : > { %s856_s29 = scalar_lea.vmem %s3360_s1, %s2269_s16  ;;  %s3367_s23 = sld [smem:[#allocation36_spill]] }
  0x9d   : > { %s861_s28 = scalar_lea.vmem %s3361_s3, %s2269_s16  ;;  %s3368_s18 = sld [smem:[#allocation37_spill]] }
  0x9e   : > { %s3369_s20 = sld [smem:[#allocation39_spill]] }
  0x9f   : > { %s3015_s0 = scalar_lea.vmem %s3362_s5, %s2269_s16 }
  0xa0   : > { %s878_s1 = scalar_lea.vmem %s3365_s10, %s2999_s30  ;;  %897 = sbr.rel (%p2163_p0) target bundleno = 168 (0xa8), region = 116 }
  0xa1   : > { %s881_s3 = scalar_lea.vmem %s3366_s12, %s2999_s30 }
  0xa2   : > { %s3037_s5 = scalar_lea.vmem %s3367_s23, %s2272_s15 }
  0xa3   : > { %s889_s6 = scalar_lea.vmem %s3368_s18, %s2999_s30 }
  0xa4   : > { %s892_s2 = scalar_lea.vmem %s3369_s20, %s2999_s30 }
  0xa5   : > { %v898_v0 = vld [vmem:[#allocation4] sm:$0xff]  ;;  %vm900_vm0 = vcmask 261120   ;;  %v899_v1 = vld [vmem:[#allocation4 + $0x8] sm:$0xff] }
  0xa6   : > { %901 = vst.msk [vmem:[#allocation2] sm:$0xff] %vm900_vm0, %v898_v0 }
  0xa7   : > { %902 = vst.msk [vmem:[#allocation2 + $0x8] sm:$0xff] %vm900_vm0, %v899_v1 }
  0xa8 PF: > { %v2274_v2 = vld [vmem:[%s856_s29 + $0x8] sm:$0xff]  ;;  %v2273_v4 = vld [vmem:[%s856_s29] sm:$0xff]  ;;  %vm950_vm1 = vcmask 261120   ;;  %s3370_s7 = scalar_lea.vmem [#allocation7], %s2974_s19  ;;  %s3371_s29 = scalar_lea.vmem %s3311_s4, %s2999_s30  ;;  %vm1034_vm2 = vcmask 64512   ;;  %vm1083_vm3 = vcmask 1043456  }
  0xa9   : > { %v2276_v3 = vld [vmem:[%s861_s28 + $0x8] sm:$0xff]  ;;  %v2275_v5 = vld [vmem:[%s861_s28] sm:$0xff]  ;;  %960 = vmatpush.bf16.msra.mxu0 %v2274_v2  ;;  %s2697_s28 = smov 112   ;;  %s2698_s17 = smov 120  }
  0xaa   : > { %992 = vmatpush.bf16.msra.mxu1 %v2276_v3  ;;  %v2376_v9 = vld [vmem:[%s3370_s7] ss:$0 sm:$0xff]  ;;  %s2699_s10 = smov 104   ;;  %v2278_v51 = vld [vmem:[%s3015_s0 + $0x8] sm:$0xff]  ;;  %s3372_s12 = sld [smem:[#allocation29_spill]] }
  0xab   : > { %v2377_v10 = vld [vmem:[%s3371_s29] ss:$0 sm:$0xff]  ;;  %1024 = vmatpush.bf16.msra.mxu2 %v2278_v51  ;;  %s2700_s16 = smov 8   ;;  %s2701_s23 = smov 24  }
  0xac   : > { %v2277_v52 = vld [vmem:[%s3015_s0] sm:$0xff]  ;;  %s2702_s24 = smov 16   ;;  %s3374_s8 = sld [smem:[#allocation31_spill]] }
  0xad   : > { %v3049_v6 = vld [vmem:[#allocation2] sm:$0xff]  ;;  %961 = vmatpush.bf16.msra.mxu0 %v2273_v4  ;;  %p2262_p7 = scmp.ne.s32.totalorder %s2887_s14, 1 }
  0xae   : > { %v3051_v7 = vld [vmem:[#allocation2 + $0x8] sm:$0xff]  ;;  %993 = vmatpush.bf16.msra.mxu1 %v2275_v5 }
  0xaf   : > { %v3055_v8 = vpack.c.bf16 %v3051_v7, %v3049_v6  ;;  %1025 = vmatpush.bf16.msra.mxu2 %v2277_v52 }
  0xb0   : > { %s3373_s27 = scalar_lea.vmem %s3372_s12, %s2999_s30 }
  0xb1   : > { %2192 = vmatmul.msk.bf16.vlgmr.msra.gmra.mxu0 %vm950_vm1, %v3055_v8  ;;  %2201 = vmatmul.msk.bf16.vlgmr.msra.gmra.mxu1 %vm950_vm1, %v3055_v8 }
  0xb2   : > { %2210 = vmatmul.msk.bf16.vlgmr.msra.gmra.mxu2 %vm950_vm1, %v3055_v8  ;;  %s3375_s9 = scalar_lea.vmem %s3374_s8, %s2999_s30 }
 0x12e   : > { %v963_v11 = vpop.f32.mrf.mxu0  ;;  %v995_v12 = vpop.f32.mrf.mxu1 }
 0x12f   : > { %v964_v13 = vadd.f32 %v2376_v9, %v963_v11  ;;  %v996_v14 = vadd.f32 %v2377_v10, %v995_v12 }
 0x131   : > { %v968_v15 = vpack.c.bf16 %v964_v13, %v964_v13  ;;  %v1000_v16 = vpack.c.bf16 %v996_v14, %v996_v14 }
 0x133   : > { %v1102_v17 = vunpack.c.l.b16 %v968_v15  ;;  %v1107_v18 = vunpack.c.l.b16 %v1000_v16  ;;  %v1039_v19 = vsel %vm1034_vm2, %v1000_v16, 0 }
 0x134   : > { %1048 = vmatpush.bf16.xpose.msra.mxu3 %v1039_v19 }
 0x135   : > { %v1103_v20 = vpack.c.b16 %v1102_v17, %v1102_v17  ;;  %v1108_v21 = vpack.c.b16 %v1107_v18, %v1107_v18 }
 0x136   : > { %v997_v22 = vpop.f32.mrf.mxu1  ;;  %v965_v23 = vpop.f32.mrf.mxu0 }
 0x137   : > { %1188 = vrot.lane.b32.xlu1 %v1108_v21, %s2697_s28  ;;  %1109 = vrot.lane.b32.xlu0 %v1108_v21, %s2698_s17  ;;  %v998_v24 = vadd.f32 %v2377_v10, %v997_v22  ;;  %v966_v25 = vadd.f32 %v2376_v9, %v965_v23 }
 0x138   : > { %1186 = vrot.lane.b32.xlu2 %v1103_v20, %s2697_s28 }
 0x139   : > { %v1001_v26 = vpack.c.bf16 %v998_v24, %v998_v24  ;;  %v969_v27 = vpack.c.bf16 %v966_v25, %v966_v25 }
 0x13b   : > { %2211 = vmatmul.msk.bf16.vlgmr.msra.gmra.mxu3 %vm1034_vm2, %v968_v15  ;;  %v1409_v28 = vunpack.c.l.b16 %v1001_v26  ;;  %v1404_v29 = vunpack.c.l.b16 %v969_v27  ;;  %v1342_v38 = vsel %vm1034_vm2, %v1001_v26, 0  ;;  %v2378_v26 = vld [vmem:[%s3373_s27] ss:$0 sm:$0xff] }
 0x13d   : > { %v1410_v30 = vpack.c.b16 %v1409_v28, %v1409_v28  ;;  %v1405_v31 = vpack.c.b16 %v1404_v29, %v1404_v29 }
 0x13f   : > { %1264 = vrot.lane.b32.xlu1 %v1108_v21, %s2699_s10  ;;  %1104 = vrot.lane.b32.xlu0 %v1103_v20, %s2698_s17 }
 0x140   : > { %1262 = vrot.lane.b32.xlu2 %v1103_v20, %s2699_s10 }
 0x147   : > { %1406 = vrot.lane.b32.xlu1 %v1405_v31, %s2698_s17  ;;  %1411 = vrot.lane.b32.xlu0 %v1410_v30, %s2698_s17 }
 0x148   : > { %1489 = vrot.lane.b32.xlu2 %v1410_v30, %s2697_s28 }
 0x14f   : > { %1487 = vrot.lane.b32.xlu1 %v1405_v31, %s2697_s28  ;;  %1564 = vrot.lane.b32.xlu0 %v1410_v30, %s2699_s10 }
 0x150   : > { %1562 = vrot.lane.b32.xlu2 %v1405_v31, %s2699_s10 }
 0x192   : > { %v1187_v32 = vpop.permute.xlu2 %1186 }
 0x19a   : > { %v1263_v33 = vpop.permute.xlu2 %1262 }
 0x1a2   : > { %v1490_v39 = vpop.permute.xlu2 %1489 }
 0x1a3   : > { %v1495_v42 = vsel %vm1034_vm2, %v1490_v39, 0 }
 0x1a9   : > { %v1189_v34 = vpop.permute.xlu1 %1188  ;;  %v1110_v35 = vpop.permute.xlu0 %1109 }
 0x1aa   : > { %v1115_v36 = vsel %vm1034_vm2, %v1110_v35, 0  ;;  %v1194_v37 = vsel %vm1034_vm2, %v1189_v34, 0  ;;  %v1563_v56 = vpop.permute.xlu2 %1562 }
 0x1ab   : > { %1124 = vmatpush.bf16.xpose.msrb.mxu1 %v1115_v36  ;;  %1203 = vmatpush.bf16.xpose.msrb.mxu3 %v1194_v37 }
 0x1b1   : > { %v1265_v40 = vpop.permute.xlu1 %1264  ;;  %v1105_v41 = vpop.permute.xlu0 %1104 }
 0x1b2   : > { %v1270_v43 = vsel %vm1034_vm2, %v1265_v40, 0  ;;  %2213 = vmatmul.msk.bf16.vlgmr.msrb.gmra.mxu1 %vm1034_vm2, %v1105_v41  ;;  %2215 = vmatmul.msk.bf16.vlgmr.msrb.gmra.mxu3 %vm1034_vm2, %v1187_v32 }
 0x1b3   : > { %1351 = vmatpush.bf16.xpose.msra.mxu3 %v1342_v38  ;;  %1279 = vmatpush.bf16.xpose.msra.mxu1 %v1270_v43 }
 0x1b9   : > { %v1412_v44 = vpop.permute.xlu0 %1411  ;;  %v1407_v54 = vpop.permute.xlu1 %1406 }
 0x1ba   : > { %v1417_v45 = vsel %vm1034_vm2, %v1412_v44, 0 }
 0x1bb   : > { %1504 = vmatpush.bf16.xpose.msrb.mxu3 %v1495_v42  ;;  %1426 = vmatpush.bf16.xpose.msrb.mxu1 %v1417_v45 }
 0x1be   : > { %v1050_v46 = vpop.f32.mrf.mxu3 }
 0x1bf   : > { %v1054_v47 = vmul.f32 0.35355338, %v1050_v46 }
 0x1c1   : > { %v1565_v48 = vpop.permute.xlu0 %1564  ;;  %v1055_v49 = vsel %vm1034_vm2, %v1054_v47, -inf  ;;  %v1488_v55 = vpop.permute.xlu1 %1487 }
 0x1c2   : > { %v1570_v50 = vsel %vm1034_vm2, %v1565_v48, 0  ;;  %2217 = vmatmul.msk.bf16.vlgmr.msra.gmra.mxu1 %vm1034_vm2, %v1263_v33  ;;  %2219 = vmatmul.msk.bf16.vlgmr.msra.gmra.mxu3 %vm1034_vm2, %v969_v27  ;;  %v1027_v27 = vpop.f32.mrf.mxu2 }
 0x1c3   : > { %1056 = vmax.xlane.f32.xlu1 %v1055_v49  ;;  %1579 = vmatpush.bf16.xpose.msra.mxu1 %v1570_v50  ;;  %v1028_v29 = vadd.f32 %v2378_v26, %v1027_v27 }
 0x1c5   : > { %v1032_v31 = vpack.c.bf16 %v1028_v29, %v1028_v29 }
 0x1c6   : > { %v1052_v53 = vpop.f32.mrf.mxu3 }
 0x1c7   : > { %v1157_v32 = vunpack.c.l.b16 %v1032_v31  ;;  %v1085_v36 = vsel %vm1083_vm3, %v1032_v31, 0 }
 0x1c8   : > { %1094 = vmatpush.bf16.msrb.mxu0 %v1085_v36 }
 0x1c9   : > { %v3129_v33 = vpack.c.b16 %v1157_v32, %v1157_v32 }
 0x1ca   : > { %v1029_v52 = vpop.f32.mrf.mxu2 }
 0x1d2   : > { %2221 = vmatmul.msk.bf16.vlgmr.msrb.gmra.mxu1 %vm1034_vm2, %v1407_v54  ;;  %2223 = vmatmul.msk.bf16.vlgmr.msrb.gmra.mxu3 %vm1034_vm2, %v1488_v55 }
 0x1e2   : > { %2225 = vmatmul.msk.bf16.vlgmr.msra.gmra.mxu1 %vm1034_vm2, %v1563_v56 }
 0x22f   : > { %v1126_v57 = vpop.f32.mrf.mxu1 }
 0x230   : > { %v1130_v58 = vmul.f32 0.35355338, %v1126_v57 }
 0x232   : > { %v1131_v59 = vsel %vm1034_vm2, %v1130_v58, -inf }
 0x233   : > { %1132 = vmax.xlane.f32.xlu0 %v1131_v59 }
 0x235   : > { %v1205_v60 = vpop.f32.mrf.mxu3 }
 0x236   : > { %v1057_v61 = vpop.xlane.xlu1 %1056  ;;  %v1209_v62 = vmul.f32 0.35355338, %v1205_v60 }
 0x237   : > { %v1058_v63 = vsub.f32 %v1054_v47, %v1057_v61  ;;  %v1128_v0 = vpop.f32.mrf.mxu1 }
 0x238   : > { %v1210_v1 = vsel %vm1034_vm2, %v1209_v62, -inf }
 0x239   : > { %v1059_v2 = vmul.f32 1.442695, %v1058_v63  ;;  %1211 = vmax.xlane.f32.xlu2 %v1210_v1 }
 0x23b   : > { %2386 = vpow2.f32 %v1059_v2 }
 0x23d   : > { %v1207_v3 = vpop.f32.mrf.mxu3 }
 0x23f   : > { %v1281_v4 = vpop.f32.mrf.mxu1 }
 0x240   : > { %v1285_v10 = vmul.f32 0.35355338, %v1281_v4 }
 0x241   : > { %v3103_v5 = vpop.eup %2386 }
 0x242   : > { %v1061_v8 = vsel %vm1034_vm2, %v3103_v5, 0.0  ;;  %v1286_v14 = vsel %vm1034_vm2, %v1285_v10, -inf }
 0x243   : > { %1062 = vadd.xlane.f32.xlu2 %v1061_v8 }
 0x245   : > { %v1353_v9 = vpop.f32.mrf.mxu3 }
 0x246   : > { %v3107_v11 = vmul.f32 0.35355338, %v1353_v9 }
 0x247   : > { %v1283_v12 = vpop.f32.mrf.mxu1 }
 0x248   : > { %v1358_v13 = vsel %vm1034_vm2, %v3107_v11, -inf }
 0x249   : > { %1359 = vmax.xlane.f32.xlu1 %v1358_v13 }
 0x24b   : > { %1287 = vmax.xlane.f32.xlu2 %v1286_v14 }
 0x24d   : > { %v1355_v15 = vpop.f32.mrf.mxu3 }
 0x24f   : > { %v1428_v16 = vpop.f32.mrf.mxu1 }
 0x250   : > { %v3112_v17 = vmul.f32 0.35355338, %v1428_v16 }
 0x252   : > { %v1433_v18 = vsel %vm1034_vm2, %v3112_v17, -inf }
 0x253   : > { %1434 = vmax.xlane.f32.xlu0 %v1433_v18 }
 0x255   : > { %v1506_v19 = vpop.f32.mrf.mxu3 }
 0x256   : > { %v3116_v20 = vmul.f32 0.35355338, %v1506_v19 }
 0x257   : > { %v1430_v21 = vpop.f32.mrf.mxu1 }
 0x258   : > { %v1511_v22 = vsel %vm1034_vm2, %v3116_v20, -inf }
 0x259   : > { %1512 = vmax.xlane.f32.xlu1 %v1511_v22 }
 0x25d   : > { %v1508_v23 = vpop.f32.mrf.mxu3 }
 0x25f   : > { %v1581_v24 = vpop.f32.mrf.mxu1 }
 0x260   : > { %v3120_v25 = vmul.f32 0.35355338, %v1581_v24 }
 0x262   : > { %v1586_v28 = vsel %vm1034_vm2, %v3120_v25, -inf }
 0x263   : > { %1587 = vmax.xlane.f32.xlu2 %v1586_v28 }
 0x267   : > { %v1583_v30 = vpop.f32.mrf.mxu1 }
 0x272   : > { %1159 = vrot.lane.b32.xlu1 %v3129_v33, %s2698_s17 }
 0x27b   : > { %1311 = vrot.lane.b32.xlu2 %v3129_v33, %s2699_s10 }
 0x2a6   : > { %v1133_v34 = vpop.xlane.xlu0 %1132 }
 0x2a7   : > { %v1134_v35 = vsub.f32 %v1130_v58, %v1133_v34  ;;  %v1030_v58 = vadd.f32 %v2378_v26, %v1029_v52 }
 0x2a9   : > { %v1135_v37 = vmul.f32 1.442695, %v1134_v35  ;;  %v3145_v0 = vpack.c.bf16 %v1030_v58, %v1030_v58 }
 0x2ab   : > { %2388 = vpow2.f32 %v1135_v37 }
 0x2ac   : > { %v1212_v38 = vpop.xlane.xlu2 %1211 }
 0x2ad   : > { %v1213_v39 = vsub.f32 %v1209_v62, %v1212_v38 }
 0x2af   : > { %v1214_v40 = vmul.f32 1.442695, %v1213_v39 }
 0x2b1   : > { %v3136_v41 = vpop.eup %2388  ;;  %2390 = vpow2.f32 %v1214_v40 }
 0x2b2   : > { %v1137_v42 = vsel %vm1034_vm2, %v3136_v41, 0.0 }
 0x2b3   : > { %1138 = vadd.xlane.f32.xlu0 %v1137_v42 }
 0x2b6   : > { %v1063_v43 = vpop.xlane.xlu2 %1062 }
 0x2b7   : > { %v3140_v44 = vpop.eup %2390  ;;  %2392 = vrcp.f32 %v1063_v43  ;;  %v1075_v53 = vand.u32 2147483648, %v1063_v43  ;;  %v1073_v57 = vand.u32 2147483647, %v1063_v43  ;;  %vm1069_vm5 = vweird.f32 %v1063_v43 }
 0x2b8   : > { %v1216_v45 = vsel %vm1034_vm2, %v3140_v44, 0.0 }
 0x2b9   : > { %1217 = vadd.xlane.f32.xlu2 %v1216_v45  ;;  %v1076_v60 = vor.u32 1.1754944e-38, %v1075_v53  ;;  %vm1074_vm7 = vcmp.eq.f32.partialorder %v1073_v57, 8.507059e+37 }
 0x2bc   : > { %v1360_v48 = vpop.xlane.xlu1 %1359 }
 0x2bd   : > { %v2393_v46 = vpop.eup %2392  ;;  %v1361_v54 = vsub.f32 %v3107_v11, %v1360_v48 }
 0x2be   : > { %v1065_v47 = vmul.f32 %v2393_v46, %v1063_v43  ;;  %v1288_v49 = vpop.xlane.xlu2 %1287  ;;  %vm1070_vm4 = vweird.f32 %v2393_v46 }
 0x2bf   : > { %v1289_v50 = vsub.f32 %v1285_v10, %v1288_v49  ;;  %vm1071_vm6 = vmor %vm1069_vm5, %vm1070_vm4  ;;  %v1362_v61 = vmul.f32 1.442695, %v1361_v54  ;;  %v1459_v10 = vunpack.c.l.b16 %v3145_v0 }
 0x2c0   : > { %v1066_v51 = vsub.f32 1.0, %v1065_v47 }
 0x2c1   : > { %v1290_v55 = vmul.f32 1.442695, %v1289_v50  ;;  %v1460_v13 = vpack.c.b16 %v1459_v10, %v1459_v10 }
 0x2c2   : > { %v1067_v56 = vmul.f32 %v2393_v46, %v1066_v51 }
 0x2c3   : > { %2394 = vpow2.f32 %v1290_v55 }
 0x2c4   : > { %v1068_v59 = vadd.f32 %v2393_v46, %v1067_v56  ;;  %2396 = vpow2.f32 %v1362_v61 }
 0x2c6   : > { %v1435_v62 = vpop.xlane.xlu0 %1434  ;;  %v1072_v63 = vsel %vm1071_vm6, %v2393_v46, %v1068_v59 }
 0x2c7   : > { %v1077_v1 = vsel %vm1074_vm7, %v1076_v60, %v1072_v63  ;;  %v1436_v4 = vsub.f32 %v3112_v17, %v1435_v62 }
 0x2c8   : > { %v1078_v2 = vmul.f32 %v3103_v5, %v1077_v1 }
 0x2c9   : > { %v3148_v3 = vpop.eup %2394  ;;  %v1437_v11 = vmul.f32 1.442695, %v1436_v4 }
 0x2ca   : > { %v1292_v8 = vsel %vm1034_vm2, %v3148_v3, 0.0  ;;  %v1079_v9 = vpack.c.bf16 %v1078_v2, %v1078_v2  ;;  %v3155_v12 = vpop.eup %2396 }
 0x2cb   : > { %1293 = vadd.xlane.f32.xlu0 %v1292_v8  ;;  %2398 = vpow2.f32 %v1437_v11  ;;  %v1364_v5 = vsel %vm1034_vm2, %v3155_v12, 0.0 }
 0x2cc   : > { %2212 = vmatmul.msk.bf16.vlgmr.msrb.gmra.mxu0 %vm1034_vm2, %v1079_v9  ;;  %v1513_v22 = vpop.xlane.xlu1 %1512 }
 0x2cd   : > { %v1514_v23 = vsub.f32 %v3116_v20, %v1513_v22 }
 0x2cf   : > { %v1515_v28 = vmul.f32 1.442695, %v1514_v23 }
 0x2d1   : > { %1461 = vrot.lane.b32.xlu2 %v1460_v13, %s2698_s17  ;;  %v3160_v15 = vpop.eup %2398 }
 0x2d2   : > { %v1439_v18 = vsel %vm1034_vm2, %v3160_v15, 0.0 }
 0x2d3   : > { %1365 = vadd.xlane.f32.xlu0 %v1364_v5 }
 0x2d6   : > { %v1588_v14 = vpop.xlane.xlu2 %1587 }
 0x2d7   : > { %v1589_v16 = vsub.f32 %v3120_v25, %v1588_v14 }
 0x2d9   : > { %v1590_v17 = vmul.f32 1.442695, %v1589_v16  ;;  %1611 = vrot.lane.b32.xlu2 %v1460_v13, %s2699_s10 }
 0x2db   : > { %2400 = vpow2.f32 %v1590_v17  ;;  %1440 = vadd.xlane.f32.xlu0 %v1439_v18 }
 0x2dc   : > { %2402 = vpow2.f32 %v1515_v28 }
 0x2de   : > { %v1312_v24 = vpop.permute.xlu2 %1311 }
 0x2df   : > { %v1317_v25 = vsel %vm1083_vm3, %v1312_v24, 0 }
 0x2e1   : > { %v3166_v19 = vpop.eup %2400  ;;  %1536 = vrot.lane.b32.xlu2 %v1460_v13, %s2697_s28 }
 0x2e2   : > { %v1592_v21 = vsel %vm1034_vm2, %v3166_v19, 0.0  ;;  %v3176_v29 = vpop.eup %2402 }
 0x2e3   : > { %1593 = vadd.xlane.f32.xlu1 %v1592_v21  ;;  %v1517_v30 = vsel %vm1034_vm2, %v3176_v29, 0.0 }
 0x2e4   : > { %v1160_v26 = vpop.permute.xlu1 %1159 }
 0x2e5   : > { %v1165_v27 = vsel %vm1083_vm3, %v1160_v26, 0 }
 0x2e6   : > { %1174 = vmatpush.bf16.msrb.mxu2 %v1165_v27 }
 0x2ea   : > { %1326 = vmatpush.bf16.msra.mxu2 %v1317_v25 }
 0x2ef   : > { %1235 = vrot.lane.b32.xlu0 %v3129_v33, %s2697_s28 }
 0x319   : > { %1518 = vadd.xlane.f32.xlu0 %v1517_v30 }
 0x326   : > { %v1139_v31 = vpop.xlane.xlu0 %1138 }
 0x327   : > { %2404 = vrcp.f32 %v1139_v31  ;;  %v1151_v35 = vand.u32 2147483648, %v1139_v31  ;;  %v1149_v37 = vand.u32 2147483647, %v1139_v31  ;;  %vm1145_vm9 = vweird.f32 %v1139_v31 }
 0x329   : > { %v1152_v39 = vor.u32 1.1754944e-38, %v1151_v35  ;;  %vm1150_vm11 = vcmp.eq.f32.partialorder %v1149_v37, 8.507059e+37 }
 0x32c   : > { %v3180_v33 = vpop.xlane.xlu2 %1217 }
 0x32d   : > { %v2405_v32 = vpop.eup %2404  ;;  %vm1224_vm4 = vweird.f32 %v3180_v33  ;;  %v1228_v17 = vand.u32 2147483647, %v3180_v33 }
 0x32e   : > { %v1141_v20 = vmul.f32 %v2405_v32, %v1139_v31  ;;  %vm1146_vm8 = vweird.f32 %v2405_v32 }
 0x32f   : > { %vm1147_vm10 = vmor %vm1145_vm9, %vm1146_vm8  ;;  %vm1229_vm7 = vcmp.eq.f32.partialorder %v1228_v17, 8.507059e+37 }
 0x330   : > { %v1142_v34 = vsub.f32 1.0, %v1141_v20 }
 0x332   : > { %v1143_v36 = vmul.f32 %v2405_v32, %v1142_v34 }
 0x334   : > { %v1144_v38 = vadd.f32 %v2405_v32, %v1143_v36  ;;  %v1462_v45 = vpop.permute.xlu2 %1461 }
 0x335   : > { %v1467_v47 = vsel %vm1083_vm3, %v1462_v45, 0 }
 0x336   : > { %v1148_v40 = vsel %vm1147_vm10, %v2405_v32, %v1144_v38 }
 0x337   : > { %v1153_v42 = vsel %vm1150_vm11, %v1152_v39, %v1148_v40 }
 0x338   : > { %v1154_v43 = vmul.f32 %v3136_v41, %v1153_v42 }
 0x33a   : > { %v1155_v46 = vpack.c.bf16 %v1154_v43, %v1154_v43 }
 0x33c   : > { %2214 = vmatmul.msk.bf16.vlgmr.msrb.gmra.mxu2 %vm1034_vm2, %v1155_v46  ;;  %v1612_v4 = vpop.permute.xlu2 %1611  ;;  %v1387_v46 = vsel %vm1083_vm3, %v3145_v0, 0 }
 0x33d   : > { %1476 = vmatpush.bf16.msrb.mxu2 %v1467_v47  ;;  %v1617_v10 = vsel %vm1083_vm3, %v1612_v4, 0 }
 0x33e   : > { %v1294_v48 = vpop.xlane.xlu0 %1293 }
 0x33f   : > { %2406 = vrcp.f32 %v1294_v48  ;;  %v1306_v41 = vand.u32 2147483648, %v1294_v48  ;;  %v1304_v57 = vand.u32 2147483647, %v1294_v48  ;;  %vm1300_vm13 = vweird.f32 %v1294_v48 }
 0x340   : > { %2408 = vrcp.f32 %v3180_v33 }
 0x341   : > { %v1307_v60 = vor.u32 1.1754944e-38, %v1306_v41  ;;  %vm1305_vm15 = vcmp.eq.f32.partialorder %v1304_v57, 8.507059e+37 }
 0x344   : > { %v1537_v39 = vpop.permute.xlu2 %1536 }
 0x345   : > { %v2407_v49 = vpop.eup %2406 }
 0x346   : > { %v2409_v50 = vpop.eup %2408  ;;  %v1296_v51 = vmul.f32 %v2407_v49, %v1294_v48  ;;  %v3186_v52 = vpop.xlane.xlu0 %1365  ;;  %vm1301_vm12 = vweird.f32 %v2407_v49 }
 0x347   : > { %v1220_v54 = vmul.f32 %v2409_v50, %v3180_v33  ;;  %vm1302_vm14 = vmor %vm1300_vm13, %vm1301_vm12  ;;  %vm1225_vm0 = vweird.f32 %v2409_v50  ;;  %v1378_v0 = vand.u32 2147483648, %v3186_v52 }
 0x348   : > { %v1297_v53 = vsub.f32 1.0, %v1296_v51  ;;  %vm1226_vm5 = vmor %vm1224_vm4, %vm1225_vm0  ;;  %v1376_v51 = vand.u32 2147483647, %v3186_v52 }
 0x349   : > { %v1096_v55 = vpop.f32.mrf.mxu0  ;;  %v1221_v59 = vsub.f32 1.0, %v1220_v54 }
 0x34a   : > { %v1298_v56 = vmul.f32 %v2407_v49, %v1297_v53  ;;  %1100 = vst.msk [vmem:[#allocation3] sm:$0xff] %vm1034_vm2, %v1096_v55  ;;  %v1379_v55 = vor.u32 1.1754944e-38, %v1378_v0  ;;  %vm1377_vm4 = vcmp.eq.f32.partialorder %v1376_v51, 8.507059e+37 }
 0x34b   : > { %v1222_v2 = vmul.f32 %v2409_v50, %v1221_v59 }
 0x34c   : > { %v1299_v58 = vadd.f32 %v2407_v49, %v1298_v56 }
 0x34d   : > { %v1223_v13 = vadd.f32 %v2409_v50, %v1222_v2 }
 0x34e   : > { %v1303_v61 = vsel %vm1302_vm14, %v2407_v49, %v1299_v58  ;;  %v1441_v62 = vpop.xlane.xlu0 %1440 }
 0x34f   : > { %v1308_v63 = vsel %vm1305_vm15, %v1307_v60, %v1303_v61  ;;  %2410 = vrcp.f32 %v1441_v62  ;;  %v1227_v21 = vsel %vm1226_vm5, %v2409_v50, %v1223_v13  ;;  %v1453_v22 = vand.u32 2147483648, %v1441_v62 }
 0x350   : > { %v1309_v1 = vmul.f32 %v3148_v3, %v1308_v63  ;;  %2412 = vrcp.f32 %v3186_v52  ;;  %v1230_v3 = vand.u32 2147483648, %v3180_v33  ;;  %v1451_v25 = vand.u32 2147483647, %v1441_v62 }
 0x351   : > { %v1098_v8 = vpop.f32.mrf.mxu0  ;;  %vm1447_vm8 = vweird.f32 %v1441_v62  ;;  %v1454_v31 = vor.u32 1.1754944e-38, %v1453_v22  ;;  %vm1372_vm15 = vweird.f32 %v3186_v52 }
 0x352   : > { %v1310_v9 = vpack.c.bf16 %v1309_v1, %v1309_v1  ;;  %v1231_v26 = vor.u32 1.1754944e-38, %v1230_v3  ;;  %vm1452_vm10 = vcmp.eq.f32.partialorder %v1451_v25, 8.507059e+37 }
 0x354   : > { %2218 = vmatmul.msk.bf16.vlgmr.msra.gmra.mxu2 %vm1034_vm2, %v1310_v9  ;;  %v1232_v30 = vsel %vm1229_vm7, %v1231_v26, %v1227_v21 }
 0x355   : > { %v2411_v11 = vpop.eup %2410  ;;  %1626 = vmatpush.bf16.msra.mxu2 %v1617_v10  ;;  %v1233_v35 = vmul.f32 %v3140_v44, %v1232_v30 }
 0x356   : > { %v1443_v5 = vmul.f32 %v2411_v11, %v1441_v62  ;;  %v1594_v14 = vpop.xlane.xlu1 %1593  ;;  %v3194_v16 = vpop.eup %2412  ;;  %vm1448_vm6 = vweird.f32 %v2411_v11 }
 0x357   : > { %2414 = vrcp.f32 %v1594_v14  ;;  %v1368_v23 = vmul.f32 %v3194_v16, %v3186_v52  ;;  %vm1449_vm9 = vmor %vm1447_vm8, %vm1448_vm6  ;;  %v1234_v44 = vpack.c.bf16 %v1233_v35, %v1233_v35  ;;  %v1606_v48 = vand.u32 2147483648, %v1594_v14 }
 0x358   : > { %v1444_v18 = vsub.f32 1.0, %v1443_v5  ;;  %vm1373_vm12 = vweird.f32 %v3194_v16  ;;  %vm1600_vm13 = vweird.f32 %v1594_v14  ;;  %v1604_v50 = vand.u32 2147483647, %v1594_v14 }
 0x359   : > { %v1369_v32 = vsub.f32 1.0, %v1368_v23  ;;  %vm1374_vm0 = vmor %vm1372_vm15, %vm1373_vm12  ;;  %v1607_v54 = vor.u32 1.1754944e-38, %v1606_v48  ;;  %v2703_v48 = vmov 32.0  }
 0x35a   : > { %v1445_v24 = vmul.f32 %v2411_v11, %v1444_v18 }
 0x35b   : > { %v1370_v40 = vmul.f32 %v3194_v16, %v1369_v32 }
 0x35c   : > { %v1446_v27 = vadd.f32 %v2411_v11, %v1445_v24 }
 0x35d   : > { %v2415_v28 = vpop.eup %2414  ;;  %v1371_v49 = vadd.f32 %v3194_v16, %v1370_v40 }
 0x35e   : > { %v1450_v20 = vsel %vm1449_vm9, %v2411_v11, %v1446_v27  ;;  %v1596_v33 = vmul.f32 %v2415_v28, %v1594_v14  ;;  %vm1601_vm11 = vweird.f32 %v2415_v28  ;;  %vm1184_vm9 = vcmask 130112  }
 0x35f   : > { %v1455_v34 = vsel %vm1452_vm10, %v1454_v31, %v1450_v20  ;;  %vm1602_vm14 = vmor %vm1600_vm13, %vm1601_vm11  ;;  %v1375_v41 = vsel %vm1374_vm0, %v3194_v16, %v1371_v49  ;;  %vm1260_vm10 = vcmask 195712   ;;  %vm1336_vm11 = vcmask 261312   ;;  %v2280_v20 = vld [vmem:[%s2982_s26 + $0x8] sm:$0xff] }
 0x360   : > { %v1456_v36 = vmul.f32 %v3160_v15, %v1455_v34  ;;  %v1597_v37 = vsub.f32 1.0, %v1596_v33  ;;  %v1542_v15 = vsel %vm1083_vm3, %v1537_v39, 0  ;;  %v1380_v57 = vsel %vm1377_vm4, %v1379_v55, %v1375_v41  ;;  %1665 = vmatpush.bf16.msra.mxu3 %v2280_v20  ;;  %v2279_v33 = vld [vmem:[%s2982_s26] sm:$0xff]  ;;  %v2379_v39 = vld [vmem:[%s3375_s9] ss:$0 sm:$0xff]  ;;  %s3376_s26 = scalar_lea.vmem [#allocation10], %s2974_s19 }
 0x361   : > { %v1236_v38 = vpop.permute.xlu0 %1235  ;;  %v1381_v59 = vmul.f32 %v3155_v12, %v1380_v57  ;;  %v2286_v20 = vld [vmem:[%s3037_s5 + $0x18] sm:$0xff]  ;;  %vm1819_vm4 = vcmask 523264  }
 0x362   : > { %v1598_v42 = vmul.f32 %v2415_v28, %v1597_v37  ;;  %v1241_v43 = vsel %vm1083_vm3, %v1236_v38, 0  ;;  %v1457_v45 = vpack.c.bf16 %v1456_v36, %v1456_v36  ;;  %vm1605_vm3 = vcmp.eq.f32.partialorder %v1604_v50, 8.507059e+37  ;;  %1827 = vmatpush.bf16.msrb.mxu1 %v2286_v20 }
 0x363   : > { %1250 = vmatpush.bf16.msra.mxu0 %v1241_v43  ;;  %v1382_v61 = vpack.c.bf16 %v1381_v59, %v1381_v59 }
 0x364   : > { %v1599_v47 = vadd.f32 %v2415_v28, %v1598_v42  ;;  %2222 = vmatmul.msk.bf16.vlgmr.msrb.gmra.mxu2 %vm1034_vm2, %v1457_v45  ;;  %1666 = vmatpush.bf16.msra.mxu3 %v2279_v33  ;;  %v2285_v33 = vld [vmem:[%s3037_s5 + $0x10] sm:$0xff] }
 0x366   : > { %2216 = vmatmul.msk.bf16.vlgmr.msra.gmra.mxu0 %vm1034_vm2, %v1234_v44  ;;  %v1603_v53 = vsel %vm1602_vm14, %v2415_v28, %v1599_v47  ;;  %1828 = vmatpush.bf16.msrb.mxu1 %v2285_v33 }
 0x367   : > { %1396 = vmatpush.bf16.msrb.mxu0 %v1387_v46  ;;  %v1608_v56 = vsel %vm1605_vm3, %v1607_v54, %v1603_v53 }
 0x368   : > { %v1609_v58 = vmul.f32 %v3166_v19, %v1608_v56 }
 0x36a   : > { %v1610_v60 = vpack.c.bf16 %v1609_v58, %v1609_v58 }
 0x36b   : > { %1551 = vmatpush.bf16.msra.mxu0 %v1542_v15 }
 0x374   : > { %2226 = vmatmul.msk.bf16.vlgmr.msra.gmra.mxu2 %vm1034_vm2, %v1610_v60 }
 0x376   : > { %2220 = vmatmul.msk.bf16.vlgmr.msrb.gmra.mxu0 %vm1034_vm2, %v1382_v61 }
 0x38c   : > { %v1519_v52 = vpop.xlane.xlu0 %1518 }
 0x38d   : > { %2416 = vrcp.f32 %v1519_v52  ;;  %v1531_v2 = vand.u32 2147483648, %v1519_v52  ;;  %v1529_v8 = vand.u32 2147483647, %v1519_v52  ;;  %vm1525_vm6 = vweird.f32 %v1519_v52 }
 0x38e   : > { %2418 = vrcp.f32 %v2703_v48 }
 0x38f   : > { %v1532_v19 = vor.u32 1.1754944e-38, %v1531_v2  ;;  %vm1530_vm8 = vcmp.eq.f32.partialorder %v1529_v8, 8.507059e+37  ;;  %v2281_v2 = vld [vmem:[%s2989_s21] sm:$0xff] }
 0x393   : > { %v2417_v62 = vpop.eup %2416 }
 0x394   : > { %v1521_v63 = vmul.f32 %v2417_v62, %v1519_v52  ;;  %vm1526_vm5 = vweird.f32 %v2417_v62  ;;  %v2419_v49 = vpop.eup %2418  ;;  %v2282_v52 = vld [vmem:[%s2989_s21 + $0x8] sm:$0xff] }
 0x395   : > { %vm1527_vm7 = vmor %vm1525_vm6, %vm1526_vm5  ;;  %v1682_v50 = vmul.f32 32.0, %v2419_v49  ;;  %1764 = vmatpush.bf16.msrb.mxu0 %v2282_v52 }
 0x396   : > { %v1522_v1 = vsub.f32 1.0, %v1521_v63 }
 0x397   : > { %v1683_v0 = vsub.f32 1.0, %v1682_v50 }
 0x398   : > { %v1523_v4 = vmul.f32 %v2417_v62, %v1522_v1 }
 0x399   : > { %v1684_v51 = vmul.f32 %v2419_v49, %v1683_v0  ;;  %1765 = vmatpush.bf16.msrb.mxu0 %v2281_v2 }
 0x39a   : > { %v1524_v9 = vadd.f32 %v2417_v62, %v1523_v4 }
 0x39b   : > { %v1685_v53 = vadd.f32 %v2419_v49, %v1684_v51 }
 0x39c   : > { %v1528_v12 = vsel %vm1527_vm7, %v2417_v62, %v1524_v9 }
 0x39d   : > { %v1533_v10 = vsel %vm1530_vm8, %v1532_v19, %v1528_v12 }
 0x39e   : > { %v1534_v11 = vmul.f32 %v3176_v29, %v1533_v10 }
 0x3a0   : > { %v1535_v13 = vpack.c.bf16 %v1534_v11, %v1534_v11 }
 0x3a2   : > { %2224 = vmatmul.msk.bf16.vlgmr.msra.gmra.mxu0 %vm1034_vm2, %v1535_v13 }
 0x3bf   : > { %v1176_v5 = vpop.f32.mrf.mxu2 }
 0x3c0   : > { %1181 = vrot.lane.b32.xlu2 %v1176_v5, %s2700_s16 }
 0x3c7   : > { %v1178_v14 = vpop.f32.mrf.mxu2 }
 0x3d7   : > { %v1328_v16 = vpop.f32.mrf.mxu2 }
 0x3d8   : > { %1333 = vrot.lane.b32.xlu0 %v1328_v16, %s2701_s23 }
 0x3df   : > { %v1330_v3 = vpop.f32.mrf.mxu2 }
 0x3e3   : > { %v1252_v17 = vpop.f32.mrf.mxu0 }
 0x3e4   : > { %1257 = vrot.lane.b32.xlu2 %v1252_v17, %s2702_s24 }
 0x3e7   : > { %v1478_v18 = vpop.f32.mrf.mxu2 }
 0x3e8   : > { %1483 = vrot.lane.b32.xlu1 %v1478_v18, %s2700_s16 }
 0x3eb   : > { %v1254_v21 = vpop.f32.mrf.mxu0 }
 0x3ef   : > { %v1480_v29 = vpop.f32.mrf.mxu2 }
 0x3f0   : > { %v2380_v29 = vld [vmem:[%s3376_s26] ss:$0 sm:$0xff] }
 0x3f3   : > { %v1398_v22 = vpop.f32.mrf.mxu0 }
 0x3f4   : > { %1402 = vst.msk [vmem:[#allocation3 + $0x8] sm:$0xff] %vm1034_vm2, %v1398_v22  ;;  %vm1686_vm2 = vweird.f32 %v2419_v49 }
 0x3f7   : > { %v1628_v23 = vpop.f32.mrf.mxu2 }
 0x3fb   : > { %v1400_v24 = vpop.f32.mrf.mxu0 }
 0x3ff   : > { %v1630_v25 = vpop.f32.mrf.mxu2 }
 0x400   : > { %v2381_v25 = vld [vmem:[%s878_s1] ss:$0 sm:$0xff] }
 0x41a   : > { %v1182_v26 = vpop.permute.xlu2 %1181 }
 0x41b   : > { %1185 = vst.msk [vmem:[#allocation3] sm:$0xff] %vm1184_vm9, %v1182_v26 }
 0x41f   : > { %v1553_v27 = vpop.f32.mrf.mxu0 }
 0x420   : > { %1558 = vrot.lane.b32.xlu2 %v1553_v27, %s2702_s24 }
 0x427   : > { %v1555_v28 = vpop.f32.mrf.mxu0 }
 0x428   : > { %1633 = vrot.lane.b32.xlu2 %v1628_v23, %s2701_s23 }
 0x43e   : > { %v1258_v30 = vpop.permute.xlu2 %1257 }
 0x43f   : > { %1261 = vst.msk [vmem:[#allocation3] sm:$0xff] %vm1260_vm10, %v1258_v30 }
 0x44a   : > { %v1334_v31 = vpop.permute.xlu0 %1333 }
 0x44b   : > { %1337 = vst.msk [vmem:[#allocation3] sm:$0xff] %vm1336_vm11, %v1334_v31 }
 0x452   : > { %v1637_v36 = vld [vmem:[#allocation3] sm:$0xff] }
 0x45a   : > { %v1484_v32 = vpop.permute.xlu1 %1483 }
 0x45b   : > { %1486 = vst.msk [vmem:[#allocation3 + $0x8] sm:$0xff] %vm1184_vm9, %v1484_v32 }
 0x47a   : > { %v1559_v34 = vpop.permute.xlu2 %1558 }
 0x47b   : > { %1561 = vst.msk [vmem:[#allocation3 + $0x8] sm:$0xff] %vm1260_vm10, %v1559_v34  ;;  %v2284_v34 = vld [vmem:[%s3037_s5 + $0x8] sm:$0xff] }
 0x47c   : > { %1829 = vmatpush.bf16.msrb.mxu1 %v2284_v34 }
 0x482   : > { %v1634_v35 = vpop.permute.xlu2 %1633 }
 0x483   : > { %1636 = vst.msk [vmem:[#allocation3 + $0x8] sm:$0xff] %vm1336_vm11, %v1634_v35  ;;  %v2382_v35 = vld [vmem:[%s881_s3] ss:$0 sm:$0xff] }
 0x48a   : > { %v1638_v37 = vld [vmem:[#allocation3 + $0x8] sm:$0xff] }
 0x48b   : > { %v1639_v38 = vpack.c.bf16 %v1638_v37, %v1637_v36  ;;  %v2283_v36 = vld [vmem:[%s3037_s5] sm:$0xff] }
 0x48c   : > { %1830 = vmatpush.bf16.msrb.mxu1 %v2283_v36 }
 0x48d   : > { %2235 = vmatmul.msk.bf16.vlgmr.msra.gmra.mxu3 %vm950_vm1, %v1639_v38 }
 0x510   : > { %v1668_v40 = vpop.f32.mrf.mxu3 }
 0x511   : > { %v1669_v42 = vadd.f32 %v2379_v39, %v1668_v40 }
 0x513   : > { %v1673_v43 = vadd.f32 %v1669_v42, %v3049_v6  ;;  %v3237_v6 = vsel %vm1686_vm2, %v2419_v49, %v1685_v53 }
 0x515   : > { %v1675_v45 = vsel %vm950_vm1, %v1673_v43, 0.0 }
 0x516   : > { %1676 = vadd.xlane.f32.xlu1 %v1675_v45 }
 0x518   : > { %v1670_v46 = vpop.f32.mrf.mxu3 }
 0x519   : > { %v1671_v47 = vadd.f32 %v2379_v39, %v1670_v46 }
 0x51b   : > { %v1674_v44 = vadd.f32 %v1671_v47, %v3051_v7 }
 0x51d   : > { %v1678_v15 = vsel %vm950_vm1, %v1674_v44, 0.0 }
 0x51e   : > { %1679 = vadd.xlane.f32.xlu2 %v1678_v15 }
 0x589   : > { %v1677_v54 = vpop.xlane.xlu1 %1676 }
 0x58a   : > { %v1688_v41 = vmul.f32 %v3237_v6, %v1677_v54 }
 0x58c   : > { %v1690_v55 = vsub.f32 %v1673_v43, %v1688_v41 }
 0x58e   : > { %v1692_v7 = vmul.f32 %v1690_v55, %v1690_v55 }
 0x590   : > { %v1694_v56 = vsel %vm950_vm1, %v1692_v7, 0.0 }
 0x591   : > { %v1680_v57 = vpop.xlane.xlu2 %1679  ;;  %1695 = vadd.xlane.f32.xlu0 %v1694_v56 }
 0x592   : > { %v1689_v58 = vmul.f32 %v3237_v6, %v1680_v57 }
 0x594   : > { %v1691_v59 = vsub.f32 %v1674_v44, %v1689_v58  ;;  %v2383_v58 = vld [vmem:[%s889_s6] ss:$0 sm:$0xff]  ;;  %s3380_s6 = scalar_lea.vmem [#allocation13], %s2974_s19 }
 0x596   : > { %v1693_v60 = vmul.f32 %v1691_v59, %v1691_v59 }
 0x598   : > { %v1697_v61 = vsel %vm950_vm1, %v1693_v60, 0.0 }
 0x599   : > { %1698 = vadd.xlane.f32.xlu1 %v1697_v61 }
 0x604   : > { %v1696_v62 = vpop.xlane.xlu0 %1695 }
 0x605   : > { %v1700_v63 = vmul.f32 %v1696_v62, %v3237_v6 }
 0x607   : > { %v1702_v1 = vadd.f32 1e-05, %v1700_v63 }
 0x609   : > { %2420 = vrsqrt.f32 %v1702_v1  ;;  %vm1710_vm13 = vweird.f32 %v1702_v1 }
 0x60c   : > { %v1699_v4 = vpop.xlane.xlu1 %1698 }
 0x60d   : > { %v1701_v8 = vmul.f32 %v1699_v4, %v3237_v6 }
 0x60f   : > { %v2421_v9 = vpop.eup %2420  ;;  %v1703_v19 = vadd.f32 1e-05, %v1701_v8 }
 0x610   : > { %v1705_v12 = vmul.f32 %v2421_v9, %v1702_v1  ;;  %vm1711_vm12 = vweird.f32 %v2421_v9 }
 0x611   : > { %2422 = vrsqrt.f32 %v1703_v19  ;;  %vm1712_vm14 = vmor %vm1710_vm13, %vm1711_vm12  ;;  %vm1720_vm0 = vweird.f32 %v1703_v19 }
 0x612   : > { %v1706_v10 = vmul.f32 %v2421_v9, %v1705_v12 }
 0x614   : > { %v1707_v11 = vmul.f32 0.5, %v1706_v10 }
 0x616   : > { %v1708_v13 = vsub.f32 1.5, %v1707_v11 }
 0x617   : > { %v2423_v5 = vpop.eup %2422 }
 0x618   : > { %v1709_v14 = vmul.f32 %v2421_v9, %v1708_v13  ;;  %v1715_v16 = vmul.f32 %v2423_v5, %v1703_v19  ;;  %vm1721_vm15 = vweird.f32 %v2423_v5 }
 0x619   : > { %vm1722_vm3 = vmor %vm1720_vm0, %vm1721_vm15 }
 0x61a   : > { %v1716_v3 = vmul.f32 %v2423_v5, %v1715_v16  ;;  %v1713_v17 = vsel %vm1712_vm14, %v2421_v9, %v1709_v14 }
 0x61b   : > { %v1724_v22 = vmul.f32 %v1713_v17, %v1690_v55 }
 0x61c   : > { %v1717_v18 = vmul.f32 0.5, %v1716_v3 }
 0x61d   : > { %v1730_v26 = vmul.f32 %v2380_v29, %v1724_v22 }
 0x61e   : > { %v1718_v21 = vsub.f32 1.5, %v1717_v18 }
 0x61f   : > { %v1736_v30 = vadd.f32 %v2381_v25, %v1730_v26 }
 0x620   : > { %v1719_v23 = vmul.f32 %v2423_v5, %v1718_v21 }
 0x622   : > { %v1723_v24 = vsel %vm1722_vm3, %v2423_v5, %v1719_v23 }
 0x623   : > { %v1725_v27 = vmul.f32 %v1723_v24, %v1691_v59 }
 0x625   : > { %v1731_v28 = vmul.f32 %v2380_v29, %v1725_v27 }
 0x627   : > { %v1737_v31 = vadd.f32 %v2381_v25, %v1731_v28 }
 0x629   : > { %v1738_v32 = vpack.c.bf16 %v1737_v31, %v1736_v30 }
 0x62b   : > { %2244 = vmatmul.msk.bf16.vlgmr.msrb.gmra.mxu0 %vm950_vm1, %v1738_v32 }
 0x6a8   : > { %v1767_v37 = vpop.f32.mrf.mxu0 }
 0x6a9   : > { %v1768_v38 = vadd.f32 %v2382_v35, %v1767_v37 }
 0x6ab   : > { %v1774_v39 = vmul.f32 %v1768_v38, %v1768_v38  ;;  %v1772_v54 = vmul.f32 0.5, %v1768_v38 }
 0x6ad   : > { %v1776_v40 = vmul.f32 %v1774_v39, %v1768_v38 }
 0x6af   : > { %v1778_v42 = vmul.f32 0.044715, %v1776_v40 }
 0x6b0   : > { %v1769_v43 = vpop.f32.mrf.mxu0 }
 0x6b1   : > { %v1780_v45 = vadd.f32 %v1778_v42, %v1768_v38  ;;  %v1770_v46 = vadd.f32 %v2382_v35, %v1769_v43 }
 0x6b3   : > { %v1775_v47 = vmul.f32 %v1770_v46, %v1770_v46  ;;  %v1782_v44 = vmul.f32 0.7978846, %v1780_v45  ;;  %v1773_v41 = vmul.f32 0.5, %v1770_v46 }
 0x6b5   : > { %v1777_v15 = vmul.f32 %v1775_v47, %v1770_v46  ;;  %2424 = vtanh.f32 %v1782_v44 }
 0x6b7   : > { %v1779_v48 = vmul.f32 0.044715, %v1777_v15 }
 0x6b9   : > { %v1781_v49 = vadd.f32 %v1779_v48, %v1770_v46 }
 0x6bb   : > { %v1783_v50 = vmul.f32 0.7978846, %v1781_v49  ;;  %v2425_v0 = vpop.eup %2424 }
 0x6bc   : > { %v1786_v51 = vadd.f32 1.0, %v2425_v0 }
 0x6bd   : > { %2426 = vtanh.f32 %v1783_v50 }
 0x6be   : > { %v1788_v7 = vmul.f32 %v1786_v51, %v1772_v54 }
 0x6c3   : > { %v2427_v53 = vpop.eup %2426 }
 0x6c4   : > { %v1787_v55 = vadd.f32 1.0, %v2427_v53 }
 0x6c6   : > { %v1789_v56 = vmul.f32 %v1787_v55, %v1773_v41 }
 0x6c8   : > { %v1790_v57 = vpack.c.bf16 %v1789_v56, %v1788_v7 }
 0x6ca   : > { %2261 = vmatmul.msk.bf16.vlgmr.msrb.gmra.mxu1 %vm1819_vm4, %v1790_v57 }
 0x747   : > { %v1832_v59 = vpop.f32.mrf.mxu1 }
 0x748   : > { %v1833_v60 = vadd.f32 %v2383_v58, %v1832_v59 }
 0x74a   : > { %v1837_v61 = vadd.f32 %v1833_v60, %v1736_v30 }
 0x74c   : > { %v1839_v52 = vsel %vm950_vm1, %v1837_v61, 0.0 }
 0x74d   : > { %1840 = vadd.xlane.f32.xlu2 %v1839_v52 }
 0x74f   : > { %v1834_v62 = vpop.f32.mrf.mxu1 }
 0x750   : > { %v1835_v63 = vadd.f32 %v2383_v58, %v1834_v62 }
 0x752   : > { %v1838_v1 = vadd.f32 %v1835_v63, %v1737_v31  ;;  %v2384_v31 = vld [vmem:[%s3380_s6] ss:$0 sm:$0xff] }
 0x754   : > { %v1842_v2 = vsel %vm950_vm1, %v1838_v1, 0.0 }
 0x755   : > { %1843 = vadd.xlane.f32.xlu1 %v1842_v2 }
 0x7c0   : > { %v1841_v4 = vpop.xlane.xlu2 %1840 }
 0x7c1   : > { %v1845_v8 = vmul.f32 %v1841_v4, %v3237_v6 }
 0x7c3   : > { %v1847_v9 = vsub.f32 %v1837_v61, %v1845_v8 }
 0x7c5   : > { %v1849_v19 = vmul.f32 %v1847_v9, %v1847_v9 }
 0x7c7   : > { %v1851_v12 = vsel %vm950_vm1, %v1849_v19, 0.0 }
 0x7c8   : > { %v1844_v10 = vpop.xlane.xlu1 %1843  ;;  %1852 = vadd.xlane.f32.xlu2 %v1851_v12 }
 0x7c9   : > { %v1846_v11 = vmul.f32 %v1844_v10, %v3237_v6 }
 0x7cb   : > { %v1848_v13 = vsub.f32 %v1838_v1, %v1846_v11 }
 0x7cd   : > { %v1850_v5 = vmul.f32 %v1848_v13, %v1848_v13 }
 0x7cf   : > { %v1854_v14 = vsel %vm950_vm1, %v1850_v5, 0.0 }
 0x7d0   : > { %1855 = vadd.xlane.f32.xlu0 %v1854_v14 }
 0x83b   : > { %v1853_v16 = vpop.xlane.xlu2 %1852 }
 0x83c   : > { %v1857_v3 = vmul.f32 %v1853_v16, %v3237_v6 }
 0x83e   : > { %v1859_v17 = vadd.f32 1e-05, %v1857_v3 }
 0x840   : > { %2428 = vrsqrt.f32 %v1859_v17  ;;  %vm1867_vm6 = vweird.f32 %v1859_v17 }
 0x843   : > { %v1856_v18 = vpop.xlane.xlu0 %1855 }
 0x844   : > { %v1858_v21 = vmul.f32 %v1856_v18, %v3237_v6  ;;  %v2385_v6 = vld [vmem:[%s892_s2] ss:$0 sm:$0xff] }
 0x846   : > { %v2429_v29 = vpop.eup %2428  ;;  %v1860_v22 = vadd.f32 1e-05, %v1858_v21 }
 0x847   : > { %v1862_v23 = vmul.f32 %v2429_v29, %v1859_v17  ;;  %vm1868_vm5 = vweird.f32 %v2429_v29 }
 0x848   : > { %2430 = vrsqrt.f32 %v1860_v22  ;;  %vm1869_vm7 = vmor %vm1867_vm6, %vm1868_vm5  ;;  %vm1877_vm9 = vweird.f32 %v1860_v22 }
 0x849   : > { %v1863_v24 = vmul.f32 %v2429_v29, %v1862_v23 }
 0x84b   : > { %v1864_v25 = vmul.f32 0.5, %v1863_v24 }
 0x84d   : > { %v1865_v26 = vsub.f32 1.5, %v1864_v25 }
 0x84e   : > { %v2431_v27 = vpop.eup %2430 }
 0x84f   : > { %v1866_v28 = vmul.f32 %v2429_v29, %v1865_v26  ;;  %v1872_v30 = vmul.f32 %v2431_v27, %v1860_v22  ;;  %vm1878_vm8 = vweird.f32 %v2431_v27 }
 0x850   : > { %vm1879_vm10 = vmor %vm1877_vm9, %vm1878_vm8 }
 0x851   : > { %v1870_v32 = vsel %vm1869_vm7, %v2429_v29, %v1866_v28  ;;  %v1873_v20 = vmul.f32 %v2431_v27, %v1872_v30 }
 0x852   : > { %v1881_v33 = vmul.f32 %v1870_v32, %v1847_v9 }
 0x853   : > { %v1874_v34 = vmul.f32 0.5, %v1873_v20 }
 0x854   : > { %v1887_v35 = vmul.f32 %v2384_v31, %v1881_v33 }
 0x855   : > { %v1875_v36 = vsub.f32 1.5, %v1874_v34 }
 0x856   : > { %v1893_v37 = vadd.f32 %v2385_v6, %v1887_v35 }
 0x857   : > { %v1876_v38 = vmul.f32 %v2431_v27, %v1875_v36 }
 0x858   : > { %1895 = vst.msk [vmem:[#allocation2] sm:$0xff] %vm950_vm1, %v1893_v37 }
 0x859   : > { %v1880_v39 = vsel %vm1879_vm10, %v2431_v27, %v1876_v38 }
 0x85a   : > { %v1882_v40 = vmul.f32 %v1880_v39, %v1848_v13 }
 0x85c   : > { %v1888_v42 = vmul.f32 %v2384_v31, %v1882_v40  ;;  %1900 = sbr.rel (%p2262_p7) target bundleno = 2147 (0x863), region = 120 }
 0x85e   : > { %v1894_v43 = vadd.f32 %v2385_v6, %v1888_v42 }
 0x860   : > { %1896 = vst.msk [vmem:[#allocation2 + $0x8] sm:$0xff] %vm950_vm1, %v1894_v43 }
 0x861   : > { %1901 = vst.msk [vmem:[#allocation15] sm:$0xff] %vm950_vm1, %v1893_v37 }
 0x862   : > { %1902 = vst.msk [vmem:[#allocation15 + $0x8] sm:$0xff] %vm950_vm1, %v1894_v43 }
 0x863 PF: > { %p2328_p10 = scmp.eq.s32.totalorder %s2887_s14, 1  ;;  %s2704_s19 = smov [#allocation15]  }
 0x864   : > { %s1908_s30 = sshll.u32 %s2704_s19, 4  ;;  %s3382_s13 = sld [smem:[#allocation40_spill]]  ;;  %s1909_s30 = int_to_ptr.vmem [resolvable:$true] %s1908_s30 }
 0x865   : > { %s2705_s27 = smov 128  }
 0x86a   : > { %s1910_s12 = sshll.u32 %s3382_s13, 4  ;;  %s1911_s12 = int_to_ptr.hbm [resolvable:$true] %s1910_s12 }
 0x86b   : > { %2302 = dma.vmem_to_hbm [thread:$0]  (%p2328_p10), %s1909_s30, 256, %s1911_s12, [#allocation6], %s2705_s27, %s2705_s27, %s2700_s16  }
 0x86c   : > { %2673 = dma.done.wait (%p2328_p10), [#allocation6], 256  }
 0x86d   : > { %2675 = vsyncadd (%p2328_p10), [#allocation6], 4294967040 }
 0x86e PF: > { %s3383_s27 = sld [smem:[#allocation22_spill]]  ;;  %s3386_s24 = smov %s2682_s25 }
 0x86f   : > { %s3384_s23 = sld [smem:[#allocation21_spill]] }
 0x870   : > { %s3385_s26 = sld [smem:[#allocation23_spill]] }
 0x874   : > { %p35_p13 = scmp.ge.s32.totalorder %s3383_s27, 4  }
 0x875   : > { %s3387_s25 = smov %s3384_s23 }
 0x876   :  { %37 = sbr.rel (!%p35_p13) target bundleno = 27 (0x1b), region = 219 }
 0x87b   :  { %1927 = vsyncpa [#allocation5], 1 }
 0x87c   :  { %1929 = vsyncpa [#allocation5 + $0x1], 1 }
 0x87d   :  { %1930 = vsyncpa [#allocation8], 1 }
 0x87e   :  { %1932 = vsyncpa [#allocation8 + $0x1], 1 }
 0x87f   :  { %1933 = vsyncpa [#allocation11], 1 }
 0x880   :  { %1935 = vsyncpa [#allocation11 + $0x1], 1 }
 0x881   :  { %1936 = vsyncpa [#allocation14], 1 }
 0x882   :  { %1938 = vsyncpa [#allocation14 + $0x1], 1 }
 0x883   :  { %1939 = vsyncpa [#allocation6], 1 }
 0x884   :  { %1941 = vsyncpa [#allocation6 + $0x1], 1 }

</bundles_post_ra>
